<compile_context>
chip_gen: v7x
topology: tpu7x:2x2x1
jax: 0.10.0
libtpu: 0.0.40
codegen_flags: <defaults>
</compile_context>

<pallas_src>
import jax
import jax.numpy as jnp
from jax.experimental import pallas as pl
from jax.experimental.pallas import tpu as pltpu


def _round_up(v, m):
    return -(-v // m) * m


# ----------------------------- Pallas kernel -------------------------------

def fused_gnn_kernel(x_ref, ea_ref, gsrc_ref, gdstT_ref,
                     vec_ref, w_ref, wout_ref, bout_ref,
                     out_ref, x_state):
    """All GNN layers fused; one grid step == one GINE layer.

    x_state (f32 VMEM scratch) carries the node features across layers; the
    output Linear is applied on the last grid step only.
    """
    l = pl.program_id(0)
    nl = pl.num_programs(0)

    @pl.when(l == 0)
    def _():
        x_state[...] = x_ref[...].astype(jnp.float32)

    x = x_state[...]                                           # (N, F) f32

    vec = vec_ref[...]                                         # (8, F) f32
    ope = vec[0:1, :]                                          # (1 + eps)
    b0 = vec[1:2, :]                                           # MLP-internal BN bias
    b1 = vec[2:3, :]                                           # outer BN bias

    # --- GINE message passing ------------------------------------------------
    # gather x[src]: bf16 one-hot (E,N) @ bf16 x (N,F), f32 accumulation
    x_src = jnp.dot(gsrc_ref[...], x.astype(jnp.bfloat16),
                    preferred_element_type=jnp.float32)        # (E, F)
    msg = jnp.maximum(x_src + ea_ref[...], 0.0)                # (E, F) f32
    # scatter-sum to dst: pre-transposed one-hot (N,E) @ bf16 msg (E,F)
    agg = jnp.dot(gdstT_ref[...], msg.astype(jnp.bfloat16),
                  preferred_element_type=jnp.float32)          # (N, F)

    h = ope * x + agg                                          # (N, F) f32

    # --- GINE internal MLP (BN scale folded into weight columns) -------------
    h = jnp.dot(h.astype(jnp.bfloat16), w_ref[0],
                preferred_element_type=jnp.float32)
    h = jnp.maximum(h + b0, 0.0)
    h = jnp.dot(h.astype(jnp.bfloat16), w_ref[1],
                preferred_element_type=jnp.float32)

    # --- outer BN (scale folded) + ReLU + residual; dropout(p=0) is a no-op ---
    h = jnp.maximum(h + b1, 0.0)
    x_new = h + x

    @pl.when(l < nl - 1)
    def _():
        x_state[...] = x_new

    # --- output Linear on the final grid step --------------------------------
    @pl.when(l == nl - 1)
    def _():
        out_ref[...] = (jnp.dot(x_new.astype(jnp.bfloat16), wout_ref[...],
                                preferred_element_type=jnp.float32)
                        + bout_ref[...])


# ------------------------------ wrapper -------------------------------------

def gnn_forward(x, edge_index, edge_attr, params):
    """Full GNN forward: one fused pallas_call over all layers + output head."""
    n, f = x.shape
    e = edge_attr.shape[0]
    nout = params["w_out"].shape[1]
    nlayer = params["eps"].shape[0]

    # Pad N, E to multiples of 128 for MXU lane occupancy; padded one-hot rows /
    # columns are all-zero so padded nodes/edges never influence real rows.
    n_pad = max(_round_up(n, 128), 128)
    e_pad = max(_round_up(e, 128), 128)

    x_p = jnp.zeros((n_pad, f), jnp.float32).at[:n].set(x.astype(jnp.float32))
    ea_p = jnp.zeros((e_pad, f), jnp.float32).at[:e].set(
        edge_attr.astype(jnp.float32))

    src, dst = edge_index[0], edge_index[1]
    # bf16 one-hot matrices (0/1 exact in bf16; halves resident VMEM).
    g_src = jnp.zeros((e_pad, n_pad), jnp.bfloat16).at[:e].set(
        jax.nn.one_hot(src, n_pad, dtype=jnp.bfloat16))          # (E, N): G @ x = x[src]
    g_dst_t = jnp.zeros((n_pad, e_pad), jnp.bfloat16).at[:, :e].set(
        jax.nn.one_hot(dst, n_pad, dtype=jnp.bfloat16).T)        # (N, E): G @ m = seg_sum

    # Fold BN scales into weight columns; pack both MLP weights per layer.
    w0f = params["w0"] * params["bn0_s"]                         # (L,F,F)*(L,1,F)
    w1f = params["w1"] * params["bnl_s"]
    layer_w = jnp.stack([w0f, w1f], axis=1).astype(jnp.bfloat16)  # (L, 2, F, F)

    # Pack per-layer row vectors into one (L, 8, F) block (8 sublanes, 1 DMA):
    # rows = [1+eps, bn0 bias, outer-BN bias, zeros...]
    ope = jnp.broadcast_to((1.0 + params["eps"])[:, None, None],
                           (nlayer, 1, f)).astype(jnp.float32)
    layer_vec = jnp.concatenate(
        [ope,
         params["bn0_b"].astype(jnp.float32),
         params["bnl_b"].astype(jnp.float32),
         jnp.zeros((nlayer, 5, f), jnp.float32)], axis=1)         # (L, 8, F)

    const2 = lambda l: (0, 0)              # resident across the layer loop
    per_layer3 = lambda l: (l, 0, 0)       # stacked per-layer vector block
    per_layer4 = lambda l: (l, 0, 0, 0)    # stacked per-layer weight block

    grid_spec = pltpu.PrefetchScalarGridSpec(
        num_scalar_prefetch=0,
        grid=(nlayer,),
        in_specs=[
            pl.BlockSpec((n_pad, f), const2),            # x (padded)
            pl.BlockSpec((e_pad, f), const2),            # edge_attr (padded)
            pl.BlockSpec((e_pad, n_pad), const2),        # g_src  (bf16)
            pl.BlockSpec((n_pad, e_pad), const2),        # g_dst^T (bf16)
            pl.BlockSpec((None, 8, f), per_layer3),      # packed per-layer vectors
            pl.BlockSpec((None, 2, f, f), per_layer4),   # packed per-layer weights
            pl.BlockSpec((f, nout), const2),             # w_out (bf16)
            pl.BlockSpec((1, nout), const2),             # b_out
        ],
        out_specs=pl.BlockSpec((n_pad, nout), const2),
        scratch_shapes=[pltpu.VMEM((n_pad, f), jnp.float32)],    # carried node feats
    )

    out = pl.pallas_call(
        fused_gnn_kernel,
        out_shape=jax.ShapeDtypeStruct((n_pad, nout), jnp.float32),
        grid_spec=grid_spec,
        compiler_params=pltpu.CompilerParams(
            dimension_semantics=("arbitrary",),          # layer loop carries state
            vmem_limit_bytes=64 * 1024 * 1024),          # explicit (v7x budget)
    )(x_p, ea_p, g_src, g_dst_t, layer_vec, layer_w,
      params["w_out"].astype(jnp.bfloat16), params["b_out"])

    return out[:n]


# -------------------------- deterministic params ---------------------------

def make_params(key, nin, nout, nlayer_gnn):
    def linear_w(k, fan_in, fan_out):
        bound = 1.0 / jnp.sqrt(fan_in)
        return jax.random.uniform(k, (fan_in, fan_out), jnp.float32, -bound, bound)

    def bn_affine(f):
        # fresh BatchNorm1d in eval mode: gamma=1, beta=0, mean=0, var=1, eps=1e-5
        gamma = jnp.ones((1, f), jnp.float32)
        beta = jnp.zeros((1, f), jnp.float32)
        mean = jnp.zeros((1, f), jnp.float32)
        var = jnp.ones((1, f), jnp.float32)
        scale = gamma / jnp.sqrt(var + 1e-5)
        bias = beta - mean * scale
        return scale, bias

    w0s, w1s, bn0_ss, bn0_bs, bnl_ss, bnl_bs, epss = [], [], [], [], [], [], []
    for _ in range(nlayer_gnn):
        key, k0, k1 = jax.random.split(key, 3)
        s0, b0 = bn_affine(nin)
        sl, bl = bn_affine(nin)
        w0s.append(linear_w(k0, nin, nin))             # MLP layer0 (bias=False, bn)
        w1s.append(linear_w(k1, nin, nin))             # MLP layer1 (bias=False, bn)
        bn0_ss.append(s0); bn0_bs.append(b0)
        bnl_ss.append(sl); bnl_bs.append(bl)
        epss.append(0.0)                               # GINEConv train_eps init = 0

    key, kw, kb = jax.random.split(key, 3)
    bound = 1.0 / jnp.sqrt(nin)
    return dict(
        eps=jnp.asarray(epss, jnp.float32),            # (L,)
        w0=jnp.stack(w0s), w1=jnp.stack(w1s),          # (L, F, F)
        bn0_s=jnp.stack(bn0_ss), bn0_b=jnp.stack(bn0_bs),   # (L, 1, F)
        bnl_s=jnp.stack(bnl_ss), bnl_b=jnp.stack(bnl_bs),   # (L, 1, F)
        w_out=linear_w(kw, nin, nout),                 # (F, NOUT)
        b_out=jax.random.uniform(kb, (1, nout), jnp.float32, -bound, bound),
    )


# ---------------------------- pure-JAX reference ----------------------------

def gnn_ref(x, edge_index, edge_attr, params):
    src, dst = edge_index[0], edge_index[1]
    prev = x
    nlayer = params["eps"].shape[0]
    for l in range(nlayer):
        msg = jnp.maximum(x[src] + edge_attr, 0.0)
        agg = jax.ops.segment_sum(msg, dst, num_segments=x.shape[0])
        h = (1.0 + params["eps"][l]) * x + agg
        h = h @ params["w0"][l]
        h = jnp.maximum(h * params["bn0_s"][l] + params["bn0_b"][l], 0.0)
        h = h @ params["w1"][l]
        h = jnp.maximum(h * params["bnl_s"][l] + params["bnl_b"][l], 0.0)
        x = h + prev
        prev = x
    return x @ params["w_out"] + params["b_out"]


# --------------------------------- main -------------------------------------

if __name__ == "__main__":
    # Lane-dense feature / output dims; node/edge counts deliberately NOT
    # multiples of 128 to exercise the wrapper-side padding path.
    NIN, NOUT, NLAYER = 128, 128, 3
    N_NODES, N_EDGES = 96, 224

    key = jax.random.PRNGKey(0)
    kx, ke, ks, kd, kp = jax.random.split(key, 5)

    x = jax.random.normal(kx, (N_NODES, NIN), jnp.float32)
    edge_attr = jax.random.normal(ke, (N_EDGES, NIN), jnp.float32)
    src = jax.random.randint(ks, (N_EDGES,), 0, N_NODES)
    dst = jax.random.randint(kd, (N_EDGES,), 0, N_NODES)
    edge_index = jnp.stack([src, dst], axis=0)

    params = make_params(kp, NIN, NOUT, NLAYER)

    out = jax.block_until_ready(gnn_forward(x, edge_index, edge_attr, params))

    ref = gnn_ref(x, edge_index, edge_attr, params)
    assert out.shape == (N_NODES, NOUT)
    # bf16 MXU operands (f32 accumulation) => validate with a relative
    # Frobenius-norm error instead of the old 1e-4 element-wise allclose.
    rel_err = float(jnp.linalg.norm(out - ref) / jnp.linalg.norm(ref))
    assert rel_err < 2e-2, f"mismatch vs JAX reference: rel_err={rel_err}"

    print("KERNEL_OK")
</pallas_src>

<mosaic_0001>
module attributes {stable_mosaic.version = 11 : i64} {
  func.func @fused_gnn_kernel(%arg0: i32, %arg1: memref<128x128xf32, #tpu.memory_space<vmem>>, %arg2: memref<256x128xf32, #tpu.memory_space<vmem>>, %arg3: memref<256x128xbf16, #tpu.memory_space<vmem>>, %arg4: memref<128x256xbf16, #tpu.memory_space<vmem>>, %arg5: memref<1x8x128xf32, #tpu.memory_space<vmem>>, %arg6: memref<1x2x128x128xbf16, #tpu.memory_space<vmem>>, %arg7: memref<128x128xbf16, #tpu.memory_space<vmem>>, %arg8: memref<1x128xf32, #tpu.memory_space<vmem>>, %arg9: memref<128x128xf32, #tpu.memory_space<vmem>>, %arg10: memref<128x128xf32, #tpu.memory_space<vmem>>) attributes {dimension_semantics = [#tpu.dimension_semantics<arbitrary>], iteration_bounds = array<i64: 3>, scalar_prefetch = 0 : i64, scratch_operands = 1 : i64, tpu.core_type = #tpu.core_type<tc>, window_params = [{pipeline_mode = #tpu.pipeline_mode<synchronous>, transform_indices = @transform_0, window_bounds = array<i64: 128, 128>}, {pipeline_mode = #tpu.pipeline_mode<synchronous>, transform_indices = @transform_1, window_bounds = array<i64: 256, 128>}, {pipeline_mode = #tpu.pipeline_mode<synchronous>, transform_indices = @transform_2, window_bounds = array<i64: 256, 128>}, {pipeline_mode = #tpu.pipeline_mode<synchronous>, transform_indices = @transform_3, window_bounds = array<i64: 128, 256>}, {transform_indices = @transform_4, window_bounds = array<i64: 1, 8, 128>}, {transform_indices = @transform_5, window_bounds = array<i64: 1, 2, 128, 128>}, {pipeline_mode = #tpu.pipeline_mode<synchronous>, transform_indices = @transform_6, window_bounds = array<i64: 128, 128>}, {pipeline_mode = #tpu.pipeline_mode<synchronous>, transform_indices = @transform_7, window_bounds = array<i64: 1, 128>}, {pipeline_mode = #tpu.pipeline_mode<synchronous>, transform_indices = @transform_8, window_bounds = array<i64: 128, 128>}]} {
    %c0_i32 = arith.constant 0 : i32
    %0 = arith.cmpi eq, %arg0, %c0_i32 : i32
    %1 = arith.extui %0 : i1 to i32
    %c0_i32_0 = arith.constant 0 : i32
    %2 = arith.cmpi ne, %1, %c0_i32_0 : i32
    scf.if %2 {
      %c0_27 = arith.constant 0 : index
      %c0_28 = arith.constant 0 : index
      %45 = vector.load %arg1[%c0_27, %c0_28] : memref<128x128xf32, #tpu.memory_space<vmem>>, vector<128x128xf32>
      %c0_29 = arith.constant 0 : index
      %c0_30 = arith.constant 0 : index
      %46 = vector.load %arg10[%c0_29, %c0_30] : memref<128x128xf32, #tpu.memory_space<vmem>>, vector<128x128xf32>
      tpu.vector_store %arg10[%c0_29, %c0_30], %45 {strides = array<i32>} : memref<128x128xf32, #tpu.memory_space<vmem>>, vector<128x128xf32>,
    } else {
    }
    %c0 = arith.constant 0 : index
    %c0_1 = arith.constant 0 : index
    %3 = vector.load %arg10[%c0, %c0_1] : memref<128x128xf32, #tpu.memory_space<vmem>>, vector<128x128xf32>
    %c0_2 = arith.constant 0 : index
    %c0_3 = arith.constant 0 : index
    %c0_4 = arith.constant 0 : index
    %4 = vector.load %arg5[%c0_2, %c0_3, %c0_4] : memref<1x8x128xf32, #tpu.memory_space<vmem>>, vector<1x8x128xf32>
    %5 = vector.shape_cast %4 : vector<1x8x128xf32> to vector<8x128xf32>
    %6 = vector.extract_strided_slice %5 {offsets = [0, 0], sizes = [1, 128], strides = [1, 1]} : vector<8x128xf32> to vector<1x128xf32>
    %7 = vector.extract_strided_slice %5 {offsets = [1, 0], sizes = [1, 128], strides = [1, 1]} : vector<8x128xf32> to vector<1x128xf32>
    %8 = vector.extract_strided_slice %5 {offsets = [2, 0], sizes = [1, 128], strides = [1, 1]} : vector<8x128xf32> to vector<1x128xf32>
    %c0_5 = arith.constant 0 : index
    %c0_6 = arith.constant 0 : index
    %9 = vector.load %arg3[%c0_5, %c0_6] : memref<256x128xbf16, #tpu.memory_space<vmem>>, vector<256x128xbf16>
    %10 = arith.truncf %3 : vector<128x128xf32> to vector<128x128xbf16>
    %cst = arith.constant dense<0.000000e+00> : vector<256x128xf32>
    %11 = tpu.matmul %9, %10, %cst {dimension_numbers = #tpu.dot_dimension_numbers<[1], [0], [0], [1], [0, 0, 1, 1], [], []>} : vector<256x128xbf16>, vector<128x128xbf16>, vector<256x128xf32> -> vector<256x128xf32>
    %c0_7 = arith.constant 0 : index
    %c0_8 = arith.constant 0 : index
    %12 = vector.load %arg2[%c0_7, %c0_8] : memref<256x128xf32, #tpu.memory_space<vmem>>, vector<256x128xf32>
    %13 = arith.addf %11, %12 : vector<256x128xf32>
    %cst_9 = arith.constant 0.000000e+00 : f32
    %14 = vector.broadcast %cst_9 : f32 to vector<256x128xf32>
    %15 = arith.maximumf %13, %14 : vector<256x128xf32>
    %c0_10 = arith.constant 0 : index
    %c0_11 = arith.constant 0 : index
    %16 = vector.load %arg4[%c0_10, %c0_11] : memref<128x256xbf16, #tpu.memory_space<vmem>>, vector<128x256xbf16>
    %17 = arith.truncf %15 : vector<256x128xf32> to vector<256x128xbf16>
    %cst_12 = arith.constant dense<0.000000e+00> : vector<128x128xf32>
    %18 = tpu.matmul %16, %17, %cst_12 {dimension_numbers = #tpu.dot_dimension_numbers<[1], [0], [0], [1], [0, 0, 1, 1], [], []>} : vector<128x256xbf16>, vector<256x128xbf16>, vector<128x128xf32> -> vector<128x128xf32>
    %19 = vector.broadcast %6 : vector<1x128xf32> to vector<128x128xf32>
    %20 = arith.mulf %19, %3 : vector<128x128xf32>
    %21 = arith.addf %20, %18 : vector<128x128xf32>
    %22 = arith.truncf %21 : vector<128x128xf32> to vector<128x128xbf16>
    %c0_13 = arith.constant 0 : index
    %c0_14 = arith.constant 0 : index
    %c0_15 = arith.constant 0 : index
    %c0_16 = arith.constant 0 : index
    %23 = vector.load %arg6[%c0_13, %c0_14, %c0_15, %c0_16] : memref<1x2x128x128xbf16, #tpu.memory_space<vmem>>, vector<1x1x128x128xbf16>
    %24 = vector.shape_cast %23 : vector<1x1x128x128xbf16> to vector<128x128xbf16>
    %cst_17 = arith.constant dense<0.000000e+00> : vector<128x128xf32>
    %25 = tpu.matmul %22, %24, %cst_17 {dimension_numbers = #tpu.dot_dimension_numbers<[1], [0], [0], [1], [0, 0, 1, 1], [], []>} : vector<128x128xbf16>, vector<128x128xbf16>, vector<128x128xf32> -> vector<128x128xf32>
    %26 = vector.broadcast %7 : vector<1x128xf32> to vector<128x128xf32>
    %27 = arith.addf %25, %26 : vector<128x128xf32>
    %cst_18 = arith.constant 0.000000e+00 : f32
    %28 = vector.broadcast %cst_18 : f32 to vector<128x128xf32>
    %29 = arith.maximumf %27, %28 : vector<128x128xf32>
    %30 = arith.truncf %29 : vector<128x128xf32> to vector<128x128xbf16>
    %c0_19 = arith.constant 0 : index
    %c1 = arith.constant 1 : index
    %c0_20 = arith.constant 0 : index
    %c0_21 = arith.constant 0 : index
    %31 = vector.load %arg6[%c0_19, %c1, %c0_20, %c0_21] : memref<1x2x128x128xbf16, #tpu.memory_space<vmem>>, vector<1x1x128x128xbf16>
    %32 = vector.shape_cast %31 : vector<1x1x128x128xbf16> to vector<128x128xbf16>
    %cst_22 = arith.constant dense<0.000000e+00> : vector<128x128xf32>
    %33 = tpu.matmul %30, %32, %cst_22 {dimension_numbers = #tpu.dot_dimension_numbers<[1], [0], [0], [1], [0, 0, 1, 1], [], []>} : vector<128x128xbf16>, vector<128x128xbf16>, vector<128x128xf32> -> vector<128x128xf32>
    %34 = vector.broadcast %8 : vector<1x128xf32> to vector<128x128xf32>
    %35 = arith.addf %33, %34 : vector<128x128xf32>
    %cst_23 = arith.constant 0.000000e+00 : f32
    %36 = vector.broadcast %cst_23 : f32 to vector<128x128xf32>
    %37 = arith.maximumf %35, %36 : vector<128x128xf32>
    %38 = arith.addf %37, %3 : vector<128x128xf32>
    %c2_i32 = arith.constant 2 : i32
    %39 = arith.cmpi slt, %arg0, %c2_i32 : i32
    %40 = arith.extui %39 : i1 to i32
    %c0_i32_24 = arith.constant 0 : i32
    %41 = arith.cmpi ne, %40, %c0_i32_24 : i32
    scf.if %41 {
      %c0_27 = arith.constant 0 : index
      %c0_28 = arith.constant 0 : index
      %45 = vector.load %arg10[%c0_27, %c0_28] : memref<128x128xf32, #tpu.memory_space<vmem>>, vector<128x128xf32>
      tpu.vector_store %arg10[%c0_27, %c0_28], %38 {strides = array<i32>} : memref<128x128xf32, #tpu.memory_space<vmem>>, vector<128x128xf32>,
    } else {
    }
    %c2_i32_25 = arith.constant 2 : i32
    %42 = arith.cmpi eq, %arg0, %c2_i32_25 : i32
    %43 = arith.extui %42 : i1 to i32
    %c0_i32_26 = arith.constant 0 : i32
    %44 = arith.cmpi ne, %43, %c0_i32_26 : i32
    scf.if %44 {
      %45 = arith.truncf %38 : vector<128x128xf32> to vector<128x128xbf16>
      %c0_27 = arith.constant 0 : index
      %c0_28 = arith.constant 0 : index
      %46 = vector.load %arg7[%c0_27, %c0_28] : memref<128x128xbf16, #tpu.memory_space<vmem>>, vector<128x128xbf16>
      %cst_29 = arith.constant dense<0.000000e+00> : vector<128x128xf32>
      %47 = tpu.matmul %45, %46, %cst_29 {dimension_numbers = #tpu.dot_dimension_numbers<[1], [0], [0], [1], [0, 0, 1, 1], [], []>} : vector<128x128xbf16>, vector<128x128xbf16>, vector<128x128xf32> -> vector<128x128xf32>
      %c0_30 = arith.constant 0 : index
      %c0_31 = arith.constant 0 : index
      %48 = vector.load %arg8[%c0_30, %c0_31] : memref<1x128xf32, #tpu.memory_space<vmem>>, vector<1x128xf32>
      %49 = vector.broadcast %48 : vector<1x128xf32> to vector<128x128xf32>
      %50 = arith.addf %47, %49 : vector<128x128xf32>
      %c0_32 = arith.constant 0 : index
      %c0_33 = arith.constant 0 : index
      %51 = vector.load %arg9[%c0_32, %c0_33] : memref<128x128xf32, #tpu.memory_space<vmem>>, vector<128x128xf32>
      tpu.vector_store %arg9[%c0_32, %c0_33], %50 {strides = array<i32>} : memref<128x128xf32, #tpu.memory_space<vmem>>, vector<128x128xf32>,
    } else {
    }
    return
  }
  func.func @transform_0(%arg0: i32) -> (i32, i32) {
    %c0_i32 = arith.constant 0 : i32
    %c0_i32_0 = arith.constant 0 : i32
    %c0_i32_1 = arith.constant 0 : i32
    return %c0_i32, %c0_i32_0 : i32, i32
  }
  func.func @transform_1(%arg0: i32) -> (i32, i32) {
    %c0_i32 = arith.constant 0 : i32
    %c0_i32_0 = arith.constant 0 : i32
    %c0_i32_1 = arith.constant 0 : i32
    return %c0_i32, %c0_i32_0 : i32, i32
  }
  func.func @transform_2(%arg0: i32) -> (i32, i32) {
    %c0_i32 = arith.constant 0 : i32
    %c0_i32_0 = arith.constant 0 : i32
    %c0_i32_1 = arith.constant 0 : i32
    return %c0_i32, %c0_i32_0 : i32, i32
  }
  func.func @transform_3(%arg0: i32) -> (i32, i32) {
    %c0_i32 = arith.constant 0 : i32
    %c0_i32_0 = arith.constant 0 : i32
    %c0_i32_1 = arith.constant 0 : i32
    return %c0_i32, %c0_i32_0 : i32, i32
  }
  func.func @transform_4(%arg0: i32) -> (i32, i32, i32) {
    %c0_i32 = arith.constant 0 : i32
    %c0_i32_0 = arith.constant 0 : i32
    %c0_i32_1 = arith.constant 0 : i32
    return %arg0, %c0_i32, %c0_i32_0 : i32, i32, i32
  }
  func.func @transform_5(%arg0: i32) -> (i32, i32, i32, i32) {
    %c0_i32 = arith.constant 0 : i32
    %c0_i32_0 = arith.constant 0 : i32
    %c0_i32_1 = arith.constant 0 : i32
    %c0_i32_2 = arith.constant 0 : i32
    return %arg0, %c0_i32, %c0_i32_0, %c0_i32_1 : i32, i32, i32, i32
  }
  func.func @transform_6(%arg0: i32) -> (i32, i32) {
    %c0_i32 = arith.constant 0 : i32
    %c0_i32_0 = arith.constant 0 : i32
    %c0_i32_1 = arith.constant 0 : i32
    return %c0_i32, %c0_i32_0 : i32, i32
  }
  func.func @transform_7(%arg0: i32) -> (i32, i32) {
    %c0_i32 = arith.constant 0 : i32
    %c0_i32_0 = arith.constant 0 : i32
    %c0_i32_1 = arith.constant 0 : i32
    return %c0_i32, %c0_i32_0 : i32, i32
  }
  func.func @transform_8(%arg0: i32) -> (i32, i32) {
    %c0_i32 = arith.constant 0 : i32
    %c0_i32_0 = arith.constant 0 : i32
    %c0_i32_1 = arith.constant 0 : i32
    return %c0_i32, %c0_i32_0 : i32, i32
  }
}

</mosaic_0001>

<bundles_post_ra>
// kernel: tpu_custom_call.1
= control target key start
LH: loop header
LB: loop body
LE: loop exit
PB: predicated region body
PF: predicated region fallthrough
CT: control target
= control target key end

     0   :  { %s3377_s0 = inlined_call_operand.hbm [shape: f32[128,128], index: 0, kind: input, shape index: {}]   ;;  %s3378_s1 = inlined_call_operand.hbm [shape: f32[256,128], index: 1, kind: input, shape index: {}]   ;;  %s3379_s2 = inlined_call_operand.hbm [shape: bf16[256,128], index: 2, kind: input, shape index: {}]   ;;  %s3380_s3 = inlined_call_operand.hbm [shape: bf16[128,256], index: 3, kind: input, shape index: {}]   ;;  %s3381_s4 = inlined_call_operand.hbm [shape: f32[3,8,128], index: 4, kind: input, shape index: {}]   ;;  %s3382_s5 = inlined_call_operand.hbm [shape: bf16[3,2,128,128], index: 5, kind: input, shape index: {}]   ;;  %s3383_s6 = inlined_call_operand.hbm [shape: bf16[128,128], index: 6, kind: input, shape index: {}]   ;;  %s3384_s7 = inlined_call_operand.hbm [shape: f32[1,128], index: 7, kind: input, shape index: {}]   ;;  %s3385_s8 = inlined_call_operand.hbm [shape: f32[128,128], index: 8, kind: output, shape index: {}]  }
   0x1   :  { %3401 = sst [smem:[#allocation25_spill]] %s3377_s0 }
   0x2   :  { %3402 = sst [smem:[#allocation26_spill]] %s3378_s1 }
   0x3   :  { %3403 = sst [smem:[#allocation27_spill]] %s3379_s2 }
   0x4   :  { %3404 = sst [smem:[#allocation28_spill]] %s3380_s3 }
   0x5   :  { %3405 = sst [smem:[#allocation29_spill]] %s3381_s4 }
   0x6   :  { %13 = vsyncpa [#allocation4], 0 }
   0x7   :  { %14 = vsyncpa [#allocation7], 0 }
   0x8   :  { %15 = vsyncpa [#allocation10], 0 }
   0x9   :  { %16 = vsyncpa [#allocation5], 0  ;;  %s2806_s27 = smov 0   ;;  %s2808_s28 = smov 0  }
   0xa   :  { %s2810_s29 = smov 0   ;;  %s2812_s30 = smov 0  }
   0xb LB: > { %3406 = sst [smem:[#allocation23_spill]] %s2740_s29  ;;  %s2746_s9 = smov [#allocation3]   ;;  %s2744_s30 = sphi %s2812_s30, %s3444_s30   ;;  %s2740_s29 = sphi %s2810_s29, %s3441_s29   ;;  %s2736_s28 = sphi %s2808_s28, %s3443_s28   ;;  %s2732_s27 = sphi %s2806_s27, %s3442_s27  }
   0xc   : > { %s238_s10 = sshll.u32 %s2746_s9, 4  ;;  %s2827_s11 = sadd.s32 4294967295, %s2744_s30   ;;  %s2833_s10 = int_to_ptr.vmem [resolvable:$true] %s238_s10 }
   0xd   : > { %p1835_p0 = scmp.ge.s32.totalorder %s2744_s30, 1  ;;  %p3388_p1 = scmp.eq.s32.totalorder %s2827_s11, 0 }
   0xe   : > { %p226_p2 = scmp.lt.s32.totalorder %s2744_s30, 4  ;;  %s2747_s13 = smov [#allocation6]  }
   0xf   : > { %s251_s14 = sshll.u32 %s2747_s13, 4  ;;  %s2748_s16 = smov [#allocation8]   ;;  %s2847_s14 = int_to_ptr.vmem [resolvable:$true] %s251_s14 }
  0x10   : > { %p2835_p4 = pnand %p1835_p0, %p226_p2  ;;  %s264_s17 = sshll.u32 %s2748_s16, 4  ;;  %s2849_s17 = int_to_ptr.vmem [resolvable:$true] %s264_s17 }
  0x11   : > { %s3409_s0 = sld [smem:[#allocation25_spill]] }
  0x12   : > { %s3407_s12 = scalar_select %p2835_p4, 1, 0 }
  0x13   : > { %p2266_p5 = pneg %p2835_p4 }
  0x15   : > { %p2843_p6 = pnand %p2266_p5, %p3388_p1 }
  0x17   : > { %s3408_s15 = scalar_select %p2843_p6, 1, 0 }
  0x18   : > { %s2432_s20 = scalar_lea.hbm %s3409_s0, 2048  ;;  %p2859_p8 = pneg %p2843_p6 }
  0x19   : > { %p2433_p7 = scmp.ne.s32.totalorder %s3409_s0, %s2432_s20  ;;  %p2439_p11 = scmp.lt.u32.totalorder %s2432_s20, %s3409_s0 }
  0x1b   : > { %p2435_p9 = pnand %p2859_p8, %p2433_p7 }
  0x1d   : > { %p2436_p10 = pneg %p2435_p9 }
  0x1f   : > { %p2441_p12 = pnand %p2439_p11, %p2436_p10 }
  0x21   : > { %2444 = shalt.err (!%p2441_p12)
}
  0x22   : > { %s2445_s26 = scalar_lea.vmem %s2833_s10, 2048  ;;  %p2453_p5 = scmp.lt.s32.totalorder %s2833_s10, %s2833_s10 }
  0x23   : > { %p2446_p13 = scmp.ne.s32.totalorder %s2833_s10, %s2445_s26  ;;  %p2454_p3 = scmp.lt.s32.totalorder %s2445_s26, %s2445_s26 }
  0x25   : > { %p2448_p0 = pnand %p2446_p13, %p2859_p8  ;;  %p2455_p7 = por %p2454_p3, %p2453_p5 }
  0x27   : > { %p2449_p2 = pneg %p2448_p0 }
  0x29   : > { %p2456_p9 = pnand %p2455_p7, %p2449_p2 }
  0x2b   : > { %2459 = shalt.err (!%p2456_p9)
}
  0x2c   : > { %s3386_s9 = smov 128   ;;  %s3387_s13 = smov 8  }
  0x2d   : > { %2269 = dma.hbm_to_vmem [thread:$0]  (!%p2843_p6), %s3409_s0, 2048, %s2833_s10, [#allocation4], %s3386_s9, %s3386_s9, %s3387_s13  }
  0x2e   : > { %s3411_s1 = sld [smem:[#allocation26_spill]] }
  0x34   : > { %s2460_s21 = scalar_lea.hbm %s3411_s1, 4096 }
  0x35   : > { %p2461_p3 = scmp.ne.s32.totalorder %s3411_s1, %s2460_s21  ;;  %p2467_p12 = scmp.lt.u32.totalorder %s2460_s21, %s3411_s1 }
  0x37   : > { %p2463_p10 = pnand %p2461_p3, %p2859_p8 }
  0x39   : > { %p2464_p11 = pneg %p2463_p10 }
  0x3b   : > { %p2469_p13 = pnand %p2467_p12, %p2464_p11 }
  0x3d   : > { %2472 = shalt.err (!%p2469_p13)
}
  0x3e   : > { %s2473_s10 = scalar_lea.vmem %s2847_s14, 4096  ;;  %p2481_p7 = scmp.lt.s32.totalorder %s2847_s14, %s2847_s14 }
  0x3f   : > { %p2474_p0 = scmp.ne.s32.totalorder %s2847_s14, %s2473_s10  ;;  %p2482_p9 = scmp.lt.s32.totalorder %s2473_s10, %s2473_s10 }
  0x41   : > { %p2476_p2 = pnand %p2474_p0, %p2859_p8  ;;  %p2483_p3 = por %p2482_p9, %p2481_p7 }
  0x43   : > { %p2477_p5 = pneg %p2476_p2 }
  0x45   : > { %p2484_p10 = pnand %p2483_p3, %p2477_p5 }
  0x47   : > { %2487 = shalt.err (!%p2484_p10)
}
  0x48   : > { %2272 = dma.hbm_to_vmem [thread:$0]  (!%p2843_p6), %s3411_s1, 4096, %s2847_s14, [#allocation7], %s3386_s9, %s3386_s9, %s3387_s13  }
  0x49   : > { %s3412_s2 = sld [smem:[#allocation27_spill]] }
  0x4f   : > { %s2488_s21 = scalar_lea.hbm %s3412_s2, 2048 }
  0x50   : > { %p2489_p11 = scmp.ne.s32.totalorder %s3412_s2, %s2488_s21  ;;  %p2495_p0 = scmp.lt.u32.totalorder %s2488_s21, %s3412_s2 }
  0x52   : > { %p2491_p12 = pnand %p2489_p11, %p2859_p8 }
  0x54   : > { %p2492_p13 = pneg %p2491_p12 }
  0x56   : > { %p2497_p2 = pnand %p2495_p0, %p2492_p13 }
  0x58   : > { %2500 = shalt.err (!%p2497_p2)
}
  0x59   : > { %s2501_s14 = scalar_lea.vmem %s2849_s17, 2048  ;;  %p2509_p3 = scmp.lt.s32.totalorder %s2849_s17, %s2849_s17 }
  0x5a   : > { %p2502_p5 = scmp.ne.s32.totalorder %s2849_s17, %s2501_s14  ;;  %p2510_p10 = scmp.lt.s32.totalorder %s2501_s14, %s2501_s14 }
  0x5c   : > { %p2504_p7 = pnand %p2502_p5, %p2859_p8  ;;  %p2511_p11 = por %p2510_p10, %p2509_p3 }
  0x5e   : > { %p2505_p9 = pneg %p2504_p7 }
  0x60   : > { %p2512_p12 = pnand %p2511_p11, %p2505_p9 }
  0x62   : > { %2515 = shalt.err (!%p2512_p12)
}
  0x63   : > { %s3390_s10 = smov 64   ;;  %s3392_s16 = smov 4  }
  0x64   : > { %2275 = dma.hbm_to_vmem [thread:$0]  (!%p2843_p6), %s3412_s2, 2048, %s2849_s17, [#allocation7], %s3390_s10, %s3390_s10, %s3392_s16  }
  0x65   : > { %s2753_s20 = smov [#allocation9]   ;;  %s3413_s3 = sld [smem:[#allocation28_spill]] }
  0x66   : > { %s277_s21 = sshll.u32 %s2753_s20, 4  ;;  %s278_s21 = int_to_ptr.vmem [resolvable:$true] %s277_s21 }
  0x6b   : > { %s2516_s25 = scalar_lea.hbm %s3413_s3, 2048 }
  0x6c   : > { %p2517_p13 = scmp.ne.s32.totalorder %s3413_s3, %s2516_s25  ;;  %p2523_p5 = scmp.lt.u32.totalorder %s2516_s25, %s3413_s3 }
  0x6e   : > { %p2519_p0 = pnand %p2517_p13, %p2859_p8 }
  0x70   : > { %p2520_p2 = pneg %p2519_p0 }
  0x72   : > { %p2525_p7 = pnand %p2523_p5, %p2520_p2 }
  0x74   : > { %2528 = shalt.err (!%p2525_p7)
}
  0x75   : > { %s2529_s17 = scalar_lea.vmem %s278_s21, 2048  ;;  %p2537_p11 = scmp.lt.s32.totalorder %s278_s21, %s278_s21 }
  0x76   : > { %p2530_p9 = scmp.ne.s32.totalorder %s278_s21, %s2529_s17  ;;  %p2538_p12 = scmp.lt.s32.totalorder %s2529_s17, %s2529_s17 }
  0x78   : > { %p2532_p3 = pnand %p2530_p9, %p2859_p8  ;;  %p2539_p1 = por %p2538_p12, %p2537_p11 }
  0x7a   : > { %p2533_p10 = pneg %p2532_p3 }
  0x7c   : > { %p2540_p4 = pnand %p2539_p1, %p2533_p10 }
  0x7e   : > { %2543 = shalt.err (!%p2540_p4)
}
  0x7f   : > { %s3414_s18 = smov 8   ;;  %s3415_s19 = smov 128  }
  0x80   : > { %2278 = dma.hbm_to_vmem [thread:$0]  (!%p2843_p6), %s3413_s3, 2048, %s278_s21, [#allocation10], %s3415_s19, %s3415_s19, %s3414_s18  }
  0x81   : > { %s2957_s20 = sadd.s32 1, %s2744_s30   ;;  %s113_s22 = sadd.s32 1, %s2740_s29 }
  0x82   : > { %s110_s24 = ssub.s32 %s2744_s30, %s2957_s20  ;;  %p120_p1 = scmp.ne.s32.totalorder %s2740_s29, %s2736_s28 }
  0x83   : > { %p111_p4 = scmp.eq.s32.totalorder %s110_s24, 0  ;;  %p121_p13 = scmp.eq.s32.totalorder %s2744_s30, 0 }
  0x84   : > { %p126_p0 = scmp.ne.s32.totalorder %s2736_s28, %s2732_s27  ;;  %p2298_p2 = scmp.lt.s32.totalorder %s2744_s30, 3 }
  0x85   : > { %s2969_s25 = scalar_select %p111_p4, %s2740_s29, %s113_s22  }
  0x86   : > { %p122_p5 = por %p121_p13, %p120_p1  ;;  %p3417_p7 = scmp.eq.s32.totalorder %s2827_s11, 0 }
  0x87   : > { %3416 = sst [smem:[#allocation24_spill]] %s2969_s25  ;;  %s315_s14 = sand.u32 1, %s2744_s30  }
  0x88   : > { %p2973_p9 = por %p3417_p7, %p126_p0  ;;  %s317_s21 = sand.u32 1, %s2740_s29  }
  0x89   : > { %s1843_s17 = sshll.u32 %s317_s21, 3  ;;  %s1844_s18 = sshll.u32 %s2744_s30, 7 }
  0x8a   : > { %s3418_s26 = scalar_select %p2973_p9, 1, 0 }
  0x8b   : > { %s3419_s4 = sld [smem:[#allocation29_spill]]  ;;  %s319_s27 = scalar_lea.vmem [#allocation11], %s1843_s17 }
  0x8c   : > { %s326_s22 = sshll.u32 %s319_s27, 4  ;;  %p2987_p3 = pnand %p2298_p2, %p122_p5  ;;  %s2985_s22 = int_to_ptr.vmem [resolvable:$true] %s326_s22 }
  0x8d   : > { %s2991_s10 = sshll.u32 %s317_s21, 7  ;;  %s2993_s16 = scalar_lea.sflag [#allocation4], %s315_s14 }
  0x8e   : > { %s3420_s24 = scalar_select %p2987_p3, 1, 0 }
  0x8f   : > { %p3397_p11 = pneg %p2987_p3 }
  0x91   : > { %s2983_s13 = scalar_lea.hbm %s3419_s4, %s1844_s18  ;;  %s2549_s9 = scalar_lea.hbm %s3419_s4, 384 }
  0x92   : > { %s2544_s18 = scalar_lea.hbm %s2983_s13, 128  ;;  %p2550_p4 = scmp.lt.u32.totalorder %s2983_s13, %s3419_s4 }
  0x93   : > { %p2545_p10 = scmp.ne.s32.totalorder %s2983_s13, %s2544_s18  ;;  %p2551_p13 = scmp.lt.u32.totalorder %s2549_s9, %s2544_s18 }
  0x94   : > { %p2553_p2 = scmp.lt.u32.totalorder %s2544_s18, %s2983_s13 }
  0x95   : > { %p2547_p12 = pnand %p3397_p11, %p2545_p10  ;;  %p2552_p0 = por %p2551_p13, %p2550_p4 }
  0x97   : > { %p2548_p1 = pneg %p2547_p12  ;;  %p2554_p5 = por %p2553_p2, %p2552_p0 }
  0x99   : > { %p2555_p7 = pnand %p2554_p5, %p2548_p1 }
  0x9b   : > { %2558 = shalt.err (!%p2555_p7)
}
  0x9c   : > { %s2559_s14 = scalar_lea.vmem %s2985_s22, 128  ;;  %s2754_s21 = smov [#allocation11]  }
  0x9d   : > { %p2560_p10 = scmp.ne.s32.totalorder %s2985_s22, %s2559_s14  ;;  %s2564_s17 = sshll.u32 %s2754_s21, 4  ;;  %s2565_s17 = int_to_ptr.vmem [resolvable:$false] %s2564_s17 }
  0x9e   : > { %s2566_s0 = scalar_lea.vmem %s2565_s17, 256  ;;  %p2567_p6 = scmp.lt.s32.totalorder %s2985_s22, %s2565_s17 }
  0x9f   : > { %p2562_p12 = pnand %p2560_p10, %p3397_p11  ;;  %p2568_p4 = scmp.lt.s32.totalorder %s2566_s0, %s2559_s14 }
  0xa1   : > { %p2563_p9 = pneg %p2562_p12  ;;  %p2569_p13 = por %p2568_p4, %p2567_p6 }
  0xa3   : > { %p2570_p0 = pnand %p2569_p13, %p2563_p9 }
  0xa5   : > { %2573 = shalt.err (!%p2570_p0)
}
  0xa6   : > { %2288 = dma.hbm_to_vmem [thread:$0]  (!%p2987_p3), %s2983_s13, 128, %s2985_s22, %s2993_s16  }
  0xa7   : > { %s337_s18 = scalar_lea.vmem [#allocation12], %s2991_s10  ;;  %s2755_s9 = smov [#allocation13]  }
  0xa8   : > { %s344_s19 = sshll.u32 %s337_s18, 4  ;;  %s290_s27 = sshll.u32 %s2755_s9, 4  ;;  %s3022_s19 = int_to_ptr.vmem [resolvable:$true] %s344_s19  ;;  %s291_s27 = int_to_ptr.vmem [resolvable:$true] %s290_s27 }
  0xa9   : > { %s2574_s17 = scalar_lea.hbm %s3383_s6, 1024 }
  0xaa   : > { %p2575_p6 = scmp.ne.s32.totalorder %s3383_s6, %s2574_s17  ;;  %p2581_p2 = scmp.lt.u32.totalorder %s2574_s17, %s3383_s6 }
  0xac   : > { %p2577_p9 = pnand %p2575_p6, %p2859_p8 }
  0xae   : > { %p2578_p1 = pneg %p2577_p9 }
  0xb0   : > { %p2583_p5 = pnand %p2581_p2, %p2578_p1 }
  0xb2   : > { %2586 = shalt.err (!%p2583_p5)
}
  0xb3   : > { %s2587_s10 = scalar_lea.vmem %s291_s27, 1024  ;;  %p2595_p4 = scmp.lt.s32.totalorder %s291_s27, %s291_s27 }
  0xb4   : > { %p2588_p7 = scmp.ne.s32.totalorder %s291_s27, %s2587_s10  ;;  %p2596_p13 = scmp.lt.s32.totalorder %s2587_s10, %s2587_s10 }
  0xb6   : > { %p2590_p10 = pnand %p2588_p7, %p2859_p8  ;;  %p2597_p0 = por %p2596_p13, %p2595_p4 }
  0xb8   : > { %p2591_p12 = pneg %p2590_p10 }
  0xba   : > { %p2598_p11 = pnand %p2597_p0, %p2591_p12 }
  0xbc   : > { %2601 = shalt.err (!%p2598_p11)
}
  0xbd   : > { %p3421_p6 = scmp.ne.s32.totalorder %s3408_s15, 0  ;;  %s3422_s1 = smov 4  }
  0xbe   : > { %s3423_s22 = smov 64   ;;  %s1937_s9 = sshll.u32 %s2744_s30, 11 }
  0xbf   : > { %2281 = dma.hbm_to_vmem [thread:$0]  (!%p3421_p6), %s3383_s6, 1024, %s291_s27, [#allocation7], %s3423_s22, %s3423_s22, %s3422_s1  }
  0xc0   : > { %s2756_s21 = smov [#allocation14]   ;;  %s3049_s13 = scalar_lea.hbm %s3382_s5, %s1937_s9 }
  0xc1   : > { %s304_s14 = sshll.u32 %s2756_s21, 4  ;;  %s2602_s4 = scalar_lea.hbm %s3384_s7, 16  ;;  %s305_s14 = int_to_ptr.vmem [resolvable:$true] %s304_s14 }
  0xc2   : > { %p2603_p11 = scmp.ne.s32.totalorder %s3384_s7, %s2602_s4  ;;  %p2609_p2 = scmp.lt.u32.totalorder %s2602_s4, %s3384_s7 }
  0xc4   : > { %p2605_p9 = pnand %p2603_p11, %p2859_p8 }
  0xc6   : > { %p2606_p1 = pneg %p2605_p9 }
  0xc8   : > { %p2611_p5 = pnand %p2609_p2, %p2606_p1 }
  0xca   : > { %2614 = shalt.err (!%p2611_p5)
}
  0xcb   : > { %s2615_s2 = scalar_lea.vmem %s305_s14, 16  ;;  %s2622_s3 = scalar_lea.vmem %s305_s14, 32 }
  0xcc   : > { %p2616_p7 = scmp.ne.s32.totalorder %s305_s14, %s2615_s2  ;;  %p2623_p4 = scmp.lt.s32.totalorder %s305_s14, %s305_s14 }
  0xcd   : > { %p2624_p13 = scmp.lt.s32.totalorder %s2622_s3, %s2615_s2 }
  0xce   : > { %p2618_p10 = pnand %p2616_p7, %p2859_p8 }
  0xcf   : > { %p2625_p0 = por %p2624_p13, %p2623_p4 }
  0xd0   : > { %p2619_p12 = pneg %p2618_p10 }
  0xd2   : > { %p2626_p3 = pnand %p2625_p0, %p2619_p12 }
  0xd4   : > { %2629 = shalt.err (!%p2626_p3)
}
  0xd5   : > { %2284 = dma.hbm_to_vmem [thread:$0]  (!%p3421_p6), %s3384_s7, 16, %s305_s14, [#allocation10]  }
  0xd6   : > { %s2630_s4 = scalar_lea.hbm %s3049_s13, 2048  ;;  %p3424_p11 = scmp.ne.s32.totalorder %s3420_s24, 0 }
  0xd7   : > { %p2631_p8 = scmp.ne.s32.totalorder %s3049_s13, %s2630_s4  ;;  %s2635_s9 = scalar_lea.hbm %s3382_s5, 6144 }
  0xd8   : > { %p3425_p9 = pneg %p3424_p11  ;;  %p2636_p3 = scmp.lt.u32.totalorder %s3049_s13, %s3382_s5 }
  0xd9   : > { %p2637_p5 = scmp.lt.u32.totalorder %s2635_s9, %s2630_s4  ;;  %p2639_p10 = scmp.lt.u32.totalorder %s2630_s4, %s3049_s13 }
  0xda   : > { %p2633_p1 = pnand %p2631_p8, %p3425_p9 }
  0xdb   : > { %p2638_p7 = por %p2637_p5, %p2636_p3 }
  0xdc   : > { %p2634_p2 = pneg %p2633_p1 }
  0xdd   : > { %p2640_p12 = por %p2639_p10, %p2638_p7 }
  0xdf   : > { %p2641_p4 = pnand %p2640_p12, %p2634_p2 }
  0xe1   : > { %2644 = shalt.err (!%p2641_p4)
}
  0xe2   : > { %s2645_s14 = scalar_lea.vmem %s3022_s19, 2048  ;;  %p3426_p13 = pmov %p3425_p9 }
  0xe3   : > { %p2646_p6 = scmp.ne.s32.totalorder %s3022_s19, %s2645_s14  ;;  %s2757_s17 = smov [#allocation12]  }
  0xe4   : > { %s2650_s0 = sshll.u32 %s2757_s17, 4  ;;  %s2651_s0 = int_to_ptr.vmem [resolvable:$false] %s2650_s0 }
  0xe5   : > { %p2648_p0 = pnand %p2646_p6, %p3426_p13  ;;  %s2652_s10 = scalar_lea.vmem %s2651_s0, 4096 }
  0xe6   : > { %p2653_p9 = scmp.lt.s32.totalorder %s3022_s19, %s2651_s0  ;;  %p2654_p1 = scmp.lt.s32.totalorder %s2652_s10, %s2645_s14 }
  0xe7   : > { %p2649_p8 = pneg %p2648_p0 }
  0xe8   : > { %p2655_p3 = por %p2654_p1, %p2653_p9 }
  0xea   : > { %p2656_p5 = pnand %p2655_p3, %p2649_p8 }
  0xec   : > { %2659 = shalt.err (!%p2656_p5)
}
  0xed   : > { %2291 = dma.hbm_to_vmem [thread:$0]  (!%p3424_p11), %s3049_s13, 2048, %s3022_s19, %s2993_s16, %s3423_s22, %s3423_s22, %s3422_s1  }
  0xee   : > { %p3427_p2 = scmp.ne.s32.totalorder %s3407_s12, 0 }
  0xef   : > { %p3428_p7 = scmp.eq.s32.totalorder (!%p3427_p2), %s2827_s11, 0 }
  0xf0   : > { %356 = sbr.rel (%p3427_p2) target bundleno = 1603 (0x643), region = 52 }
  0xf7   : > { %2703 = dma.done.wait (%p3428_p7), [#allocation4], 2048   ;;  %p3429_p10 = pmov %p3428_p7 }
  0xf8   : > { %p3430_p12 = pmov %p3428_p7 }
  0xf9   : > { %2705 = vsyncadd (%p3429_p10), [#allocation4], 4294965248 }
  0xfa   : > { %2707 = dma.done.wait (%p3430_p12), [#allocation7], 6144   ;;  %p3431_p4 = pmov %p3428_p7 }
  0xfc   : > { %2709 = vsyncadd (%p3431_p4), [#allocation7], 4294961152  ;;  %p3432_p6 = pmov %p3431_p4 }
  0xfd   : > { %p3433_p11 = pmov %p3431_p4 }
  0xfe   : > { %2711 = dma.done.wait (%p3432_p6), [#allocation10], 2048  }
  0xff   : > { %2713 = vsyncadd (%p3433_p11), [#allocation10], 4294965248  ;;  %s374_s12 = sand.u32 1, %s2827_s11   ;;  %s376_s16 = sand.u32 1, %s2736_s28  }
 0x100   : > { %s3112_s24 = sshll.u32 %s376_s16, 3  ;;  %s375_s19 = scalar_lea.sflag [#allocation4], %s374_s12 }
 0x101   : > { %s378_s1 = scalar_lea.vmem [#allocation11], %s3112_s24  ;;  %p3434_p13 = scmp.ne.s32.totalorder %s3418_s26, 0 }
 0x103   : > { %2715 = dma.done.wait (%p3434_p13), %s375_s19, 2176  }
 0x104   : > { %2717 = vsyncadd (%p3434_p13), %s375_s19, 4294965120  ;;  %s1854_s22 = sshll.u32 %s376_s16, 7  ;;  %p3435_p0 = pmov %p3431_p4 }
 0x105   : > { %s3119_s13 = scalar_lea.vmem [#allocation12], %s1854_s22 }
 0x106   : > { %2719 = dma.done.wait (%p3435_p0), [#allocation7], 1024   ;;  %p3436_p8 = pmov %p3435_p0 }
 0x107   : > { %p3437_p9 = pmov %p3435_p0 }
 0x108   : > { %2721 = vsyncadd (%p3436_p8), [#allocation7], 4294966272 }
 0x109   : > { %2723 = dma.done.wait (%p3437_p9), [#allocation10], 16   ;;  %p3438_p1 = pmov %p3435_p0 }
 0x10a   : > { %p3439_p3 = scmp.ne.s32.totalorder %s2827_s11, 0 }
 0x10b   : > { %2725 = vsyncadd (%p3438_p1), [#allocation10], 4294967280  ;;  %v433_v0 = vld [vmem:[#allocation3] sm:$0xff] (!%p3439_p3)  ;;  %v434_v1 = vld [vmem:[#allocation3 + $0x8] sm:$0xff] (!%p3439_p3) }
 0x10c   : > { %432 = sbr.rel (%p3439_p3) target bundleno = 276 (0x114), region = 88  ;;  %v435_v2 = vld [vmem:[#allocation3 + $0x10] sm:$0xff] (!%p3439_p3)  ;;  %449 = vst [vmem:[#allocation2] sm:$0xff] (!%p3439_p3), %v433_v0  ;;  %450 = vst [vmem:[#allocation2 + $0x8] sm:$0xff] (!%p3439_p3), %v434_v1  ;;  %v436_v3 = vld [vmem:[#allocation3 + $0x18] sm:$0xff] (!%p3439_p3) }
 0x10d   : > { %451 = vst [vmem:[#allocation2 + $0x10] sm:$0xff] (!%p3439_p3), %v435_v2  ;;  %v437_v4 = vld [vmem:[#allocation3 + $0x20] sm:$0xff] (!%p3439_p3)  ;;  %v438_v5 = vld [vmem:[#allocation3 + $0x28] sm:$0xff] (!%p3439_p3)  ;;  %452 = vst [vmem:[#allocation2 + $0x18] sm:$0xff] (!%p3439_p3), %v436_v3 }
 0x10e   : > { %453 = vst [vmem:[#allocation2 + $0x20] sm:$0xff] (!%p3439_p3), %v437_v4  ;;  %454 = vst [vmem:[#allocation2 + $0x28] sm:$0xff] (!%p3439_p3), %v438_v5  ;;  %v439_v6 = vld [vmem:[#allocation3 + $0x30] sm:$0xff] (!%p3439_p3)  ;;  %v440_v7 = vld [vmem:[#allocation3 + $0x38] sm:$0xff] (!%p3439_p3) }
 0x10f   : > { %v441_v8 = vld [vmem:[#allocation3 + $0x40] sm:$0xff] (!%p3439_p3)  ;;  %455 = vst [vmem:[#allocation2 + $0x30] sm:$0xff] (!%p3439_p3), %v439_v6  ;;  %456 = vst [vmem:[#allocation2 + $0x38] sm:$0xff] (!%p3439_p3), %v440_v7  ;;  %v442_v9 = vld [vmem:[#allocation3 + $0x48] sm:$0xff] (!%p3439_p3) }
 0x110   : > { %457 = vst [vmem:[#allocation2 + $0x40] sm:$0xff] (!%p3439_p3), %v441_v8  ;;  %v443_v10 = vld [vmem:[#allocation3 + $0x50] sm:$0xff] (!%p3439_p3)  ;;  %v444_v11 = vld [vmem:[#allocation3 + $0x58] sm:$0xff] (!%p3439_p3)  ;;  %458 = vst [vmem:[#allocation2 + $0x48] sm:$0xff] (!%p3439_p3), %v442_v9 }
 0x111   : > { %459 = vst [vmem:[#allocation2 + $0x50] sm:$0xff] (!%p3439_p3), %v443_v10  ;;  %460 = vst [vmem:[#allocation2 + $0x58] sm:$0xff] (!%p3439_p3), %v444_v11  ;;  %v445_v12 = vld [vmem:[#allocation3 + $0x60] sm:$0xff] (!%p3439_p3)  ;;  %v446_v13 = vld [vmem:[#allocation3 + $0x68] sm:$0xff] (!%p3439_p3) }
 0x112   : > { %v447_v14 = vld [vmem:[#allocation3 + $0x70] sm:$0xff] (!%p3439_p3)  ;;  %461 = vst [vmem:[#allocation2 + $0x60] sm:$0xff] (!%p3439_p3), %v445_v12  ;;  %462 = vst [vmem:[#allocation2 + $0x68] sm:$0xff] (!%p3439_p3), %v446_v13  ;;  %v448_v15 = vld [vmem:[#allocation3 + $0x78] sm:$0xff] (!%p3439_p3) }
 0x113   : > { %463 = vst [vmem:[#allocation2 + $0x70] sm:$0xff] %v447_v14  ;;  %464 = vst [vmem:[#allocation2 + $0x78] sm:$0xff] %v448_v15 }
 0x114 PF: > { %v3131_v16 = vld [vmem:[#allocation2] sm:$0xff]  ;;  %v3133_v17 = vld [vmem:[#allocation2 + $0x8] sm:$0xff]  ;;  %v2354_v42 = vld [vmem:[#allocation8 + $0x10] sm:$0xff]   ;;  %p1922_p5 = scmp.ge.s32.totalorder %s2827_s11, 2 }
 0x115   : > { %v3135_v18 = vld [vmem:[#allocation2 + $0x10] sm:$0xff]  ;;  %v514_v19 = vpack.c.bf16 %v3133_v17, %v3131_v16  ;;  %v3139_v20 = vld [vmem:[#allocation2 + $0x18] sm:$0xff]  ;;  %v2352_v27 = vld [vmem:[#allocation8] sm:$0xff]  }
 0x116   : > { %v515_v21 = vpack.c.bf16 %v3139_v20, %v3135_v18  ;;  %v3143_v22 = vld [vmem:[#allocation2 + $0x20] sm:$0xff]  ;;  %v3145_v23 = vld [vmem:[#allocation2 + $0x28] sm:$0xff]  ;;  %2090 = vmatprep.mubr.bf16.mxu0 %v2352_v27  ;;  %v2355_v43 = vld [vmem:[#allocation8 + $0x18] sm:$0xff]  }
 0x117   : > { %2074 = vmatprep.subr.bf16.mxu0 %v514_v19  ;;  %v3147_v24 = vld [vmem:[#allocation2 + $0x30] sm:$0xff]  ;;  %v516_v25 = vpack.c.bf16 %v3145_v23, %v3143_v22  ;;  %v3151_v26 = vld [vmem:[#allocation2 + $0x38] sm:$0xff]  ;;  %v2353_v41 = vld [vmem:[#allocation8 + $0x8] sm:$0xff]  }
 0x118   : > { %2075 = vmatpush3.bf16.msra.mxu0 %v514_v19  ;;  %v517_v28 = vpack.c.bf16 %v3151_v26, %v3147_v24  ;;  %v3155_v29 = vld [vmem:[#allocation2 + $0x40] sm:$0xff]  ;;  %v3157_v30 = vld [vmem:[#allocation2 + $0x48] sm:$0xff]  ;;  %v2358_v46 = vld [vmem:[#allocation8 + $0x30] sm:$0xff]  }
 0x119   : > { %2076 = vmatprep.subr.bf16.mxu0 %v515_v21  ;;  %v518_v31 = vpack.c.bf16 %v3157_v30, %v3155_v29  ;;  %v3161_v32 = vld [vmem:[#allocation2 + $0x50] sm:$0xff]  ;;  %v3163_v33 = vld [vmem:[#allocation2 + $0x58] sm:$0xff]  ;;  %v2356_v44 = vld [vmem:[#allocation8 + $0x20] sm:$0xff]  }
 0x11a   : > { %v519_v34 = vpack.c.bf16 %v3163_v33, %v3161_v32  ;;  %v3167_v35 = vld [vmem:[#allocation2 + $0x60] sm:$0xff]  ;;  %v3169_v36 = vld [vmem:[#allocation2 + $0x68] sm:$0xff]  ;;  %v3173_v38 = vld [vmem:[#allocation2 + $0x70] sm:$0xff] }
 0x11b   : > { %v520_v37 = vpack.c.bf16 %v3169_v36, %v3167_v35  ;;  %v3175_v39 = vld [vmem:[#allocation2 + $0x78] sm:$0xff]  ;;  %v2357_v45 = vld [vmem:[#allocation8 + $0x28] sm:$0xff]   ;;  %v2360_v48 = vld [vmem:[#allocation8 + $0x40] sm:$0xff]  }
 0x11c   : > { %2077 = vmatpush3.bf16.msra.mxu0 %v515_v21  ;;  %v521_v40 = vpack.c.bf16 %v3175_v39, %v3173_v38  ;;  %v2359_v47 = vld [vmem:[#allocation8 + $0x38] sm:$0xff]   ;;  %v2361_v49 = vld [vmem:[#allocation8 + $0x48] sm:$0xff]   ;;  %v2362_v50 = vld [vmem:[#allocation8 + $0x50] sm:$0xff]  }
 0x11d   : > { %2078 = vmatprep.subr.bf16.mxu0 %v516_v25  ;;  %v2363_v51 = vld [vmem:[#allocation8 + $0x58] sm:$0xff]   ;;  %v2364_v52 = vld [vmem:[#allocation8 + $0x60] sm:$0xff]   ;;  %v2365_v53 = vld [vmem:[#allocation8 + $0x68] sm:$0xff]  }
 0x11e   : > { %v2366_v54 = vld [vmem:[#allocation8 + $0x70] sm:$0xff]   ;;  %v2367_v55 = vld [vmem:[#allocation8 + $0x78] sm:$0xff]   ;;  %v2370_v56 = vld [vmem:[#allocation9 + $0x4] ss:$8 sps:$4 sm:$0xff]  }
 0x11f   : > { %987 = vmatprep.mubr.bf16.mxu1 %v2370_v56  ;;  %v524_v57 = vld [vmem:[#allocation6 + $0x10] sm:$0xff]  ;;  %v522_v58 = vld [vmem:[#allocation6] sm:$0xff]  ;;  %v525_v60 = vld [vmem:[#allocation6 + $0x18] sm:$0xff] }
 0x120   : > { %2079 = vmatpush3.bf16.msra.mxu0 %v516_v25  ;;  %v523_v63 = vld [vmem:[#allocation6 + $0x8] sm:$0xff]  ;;  %v2392_v2 = vld [vmem:[%s3119_s13] sm:$0xff]   ;;  %v2393_v3 = vld [vmem:[%s3119_s13 + $0x8] sm:$0xff]  }
 0x121   : > { %2080 = vmatprep.subr.bf16.mxu0 %v517_v28  ;;  %v528_v11 = vld [vmem:[#allocation6 + $0x30] sm:$0xff]  ;;  %v2394_v12 = vld [vmem:[%s3119_s13 + $0x10] sm:$0xff]   ;;  %v529_v19 = vld [vmem:[#allocation6 + $0x38] sm:$0xff] }
 0x122   : > { %v526_v14 = vld [vmem:[#allocation6 + $0x20] sm:$0xff] }
 0x124   : > { %2081 = vmatpush3.bf16.msra.mxu0 %v517_v28  ;;  %v527_v28 = vld [vmem:[#allocation6 + $0x28] sm:$0xff] }
 0x125   : > { %2082 = vmatprep.subr.bf16.mxu0 %v518_v31 }
 0x128   : > { %2083 = vmatpush3.bf16.msra.mxu0 %v518_v31 }
 0x129   : > { %2084 = vmatprep.subr.bf16.mxu0 %v519_v34 }
 0x12c   : > { %2085 = vmatpush3.bf16.msra.mxu0 %v519_v34 }
 0x12d   : > { %2086 = vmatprep.subr.bf16.mxu0 %v520_v37 }
 0x130   : > { %2087 = vmatpush3.bf16.msra.mxu0 %v520_v37  ;;  %v2395_v37 = vld [vmem:[%s3119_s13 + $0x18] sm:$0xff]  }
 0x131   : > { %2088 = vmatprep.subr.bf16.mxu0 %v521_v40 }
 0x134   : > { %2089 = vmatpush3.bf16.msra.mxu0 %v521_v40 }
 0x135   : > { %2122 = vmatprep.subr.bf16.mxu0 %v2392_v2 }
 0x137   : > { %2091 = vmatmul.mubr.bf16.vlgmr.msra.gmra.mrb[0].mxu0 %v2353_v41 }
 0x138   : > { %2094 = vmatprep.mubr.bf16.mxu0 %v2354_v42  ;;  %2123 = vmatpush3.bf16.msra.mxu0 %v2392_v2 }
 0x139   : > { %2124 = vmatprep.subr.bf16.mxu0 %v2393_v3 }
 0x13c   : > { %2125 = vmatpush3.bf16.msra.mxu0 %v2393_v3  ;;  %v534_v3 = vld [vmem:[#allocation6 + $0x60] sm:$0xff] }
 0x13d   : > { %2126 = vmatprep.subr.bf16.mxu0 %v2394_v12 }
 0x13f   : > { %2095 = vmatmul.mubr.bf16.gmra.mrb[4].mxu0 %v2355_v43 }
 0x140   : > { %2098 = vmatprep.mubr.bf16.mxu0 %v2356_v44  ;;  %2127 = vmatpush3.bf16.msra.mxu0 %v2394_v12 }
 0x141   : > { %2128 = vmatprep.subr.bf16.mxu0 %v2395_v37 }
 0x144   : > { %2129 = vmatpush3.bf16.msra.mxu0 %v2395_v37  ;;  %v538_v37 = vld [vmem:[#allocation6 + $0x80] sm:$0xff] }
 0x147   : > { %2099 = vmatmul.mubr.bf16.gmra.mrb[8].mxu0 %v2357_v45 }
 0x148   : > { %2102 = vmatprep.mubr.bf16.mxu0 %v2358_v46 }
 0x14f   : > { %2103 = vmatmul.mubr.bf16.gmra.mrb[12].mxu0 %v2359_v47  ;;  %v532_v47 = vld [vmem:[#allocation6 + $0x50] sm:$0xff] }
 0x150   : > { %2106 = vmatprep.mubr.bf16.mxu0 %v2360_v48 }
 0x157   : > { %2107 = vmatmul.mubr.bf16.gmra.mrb[16].mxu0 %v2361_v49  ;;  %v530_v49 = vld [vmem:[#allocation6 + $0x40] sm:$0xff] }
 0x158   : > { %2110 = vmatprep.mubr.bf16.mxu0 %v2362_v50 }
 0x15f   : > { %2111 = vmatmul.mubr.bf16.gmra.mrb[20].mxu0 %v2363_v51 }
 0x160   : > { %2114 = vmatprep.mubr.bf16.mxu0 %v2364_v52  ;;  %v533_v52 = vld [vmem:[#allocation6 + $0x58] sm:$0xff] }
 0x167   : > { %2115 = vmatmul.mubr.bf16.gmra.mrb[24].mxu0 %v2365_v53 }
 0x168   : > { %2118 = vmatprep.mubr.bf16.mxu0 %v2366_v54 }
 0x16f   : > { %2119 = vmatmul.mubr.bf16.gmra.mrb[28].mxu0 %v2367_v55  ;;  %v531_v55 = vld [vmem:[#allocation6 + $0x48] sm:$0xff] }
 0x20a   : > { %v2092_v59 = vpop.f32.mrb[0].mxu0 }
 0x20b   : > { %v693_v61 = vadd.f32 %v2092_v59, %v524_v57  ;;  %v684_v62 = vpop.f32.mrb[1].mxu0 }
 0x20c   : > { %v685_v0 = vadd.f32 %v684_v62, %v522_v58  ;;  %v2093_v1 = vpop.f32.mrb[2].mxu0 }
 0x20d   : > { %v696_v4 = vadd.f32 %v2093_v1, %v525_v60  ;;  %v687_v5 = vpop.f32.mrb[3].mxu0  ;;  %v813_v7 = vmax.f32 %v693_v61, 0.0  ;;  %v536_v1 = vld [vmem:[#allocation6 + $0x70] sm:$0xff] }
 0x20e   : > { %v688_v6 = vadd.f32 %v687_v5, %v523_v63  ;;  %v811_v9 = vmax.f32 %v685_v0, 0.0 }
 0x20f   : > { %v814_v8 = vmax.f32 %v696_v4, 0.0 }
 0x210   : > { %v812_v10 = vmax.f32 %v688_v6, 0.0  ;;  %v537_v6 = vld [vmem:[#allocation6 + $0x78] sm:$0xff] }
 0x211   : > { %v3182_v13 = vpack.c.bf16 %v814_v8, %v813_v7 }
 0x212   : > { %v2096_v15 = vpop.f32.mrb[4].mxu0  ;;  %v3184_v21 = vpack.c.bf16 %v812_v10, %v811_v9  ;;  %v535_v9 = vld [vmem:[#allocation6 + $0x68] sm:$0xff] }
 0x213   : > { %v709_v25 = vadd.f32 %v2096_v15, %v528_v11  ;;  %v700_v27 = vpop.f32.mrb[5].mxu0 }
 0x214   : > { %v701_v31 = vadd.f32 %v700_v27, %v526_v14  ;;  %v2097_v34 = vpop.f32.mrb[6].mxu0 }
 0x215   : > { %v712_v40 = vadd.f32 %v2097_v34, %v529_v19  ;;  %v703_v41 = vpop.f32.mrb[7].mxu0  ;;  %v817_v43 = vmax.f32 %v709_v25, 0.0 }
 0x216   : > { %v704_v42 = vadd.f32 %v703_v41, %v527_v28  ;;  %v815_v45 = vmax.f32 %v701_v31, 0.0  ;;  %v540_v31 = vld [vmem:[#allocation6 + $0x90] sm:$0xff] }
 0x217   : > { %v818_v44 = vmax.f32 %v712_v40, 0.0 }
 0x218   : > { %v816_v46 = vmax.f32 %v704_v42, 0.0  ;;  %v541_v42 = vld [vmem:[#allocation6 + $0x98] sm:$0xff] }
 0x219   : > { %v3187_v48 = vpack.c.bf16 %v818_v44, %v817_v43 }
 0x21a   : > { %v3189_v50 = vpack.c.bf16 %v816_v46, %v815_v45  ;;  %v2100_v51 = vpop.f32.mrb[8].mxu0  ;;  %v539_v45 = vld [vmem:[#allocation6 + $0x88] sm:$0xff] }
 0x21b   : > { %v725_v53 = vadd.f32 %v2100_v51, %v532_v47  ;;  %v716_v54 = vpop.f32.mrb[9].mxu0 }
 0x21c   : > { %v717_v56 = vadd.f32 %v716_v54, %v530_v49  ;;  %v2101_v57 = vpop.f32.mrb[10].mxu0 }
 0x21d   : > { %v728_v58 = vadd.f32 %v2101_v57, %v533_v52  ;;  %v719_v59 = vpop.f32.mrb[11].mxu0  ;;  %v821_v61 = vmax.f32 %v725_v53, 0.0  ;;  %v544_v57 = vld [vmem:[#allocation6 + $0xb0] sm:$0xff] }
 0x21e   : > { %v720_v60 = vadd.f32 %v719_v59, %v531_v55  ;;  %v819_v63 = vmax.f32 %v717_v56, 0.0  ;;  %v542_v59 = vld [vmem:[#allocation6 + $0xa0] sm:$0xff] }
 0x21f   : > { %v822_v62 = vmax.f32 %v728_v58, 0.0 }
 0x220   : > { %v820_v0 = vmax.f32 %v720_v60, 0.0 }
 0x221   : > { %v3191_v2 = vpack.c.bf16 %v822_v62, %v821_v61  ;;  %v545_v61 = vld [vmem:[#allocation6 + $0xb8] sm:$0xff] }
 0x222   : > { %v3193_v4 = vpack.c.bf16 %v820_v0, %v819_v63  ;;  %v2104_v5 = vpop.f32.mrb[12].mxu0 }
 0x223   : > { %v741_v7 = vadd.f32 %v2104_v5, %v536_v1  ;;  %v732_v8 = vpop.f32.mrb[13].mxu0  ;;  %v543_v1 = vld [vmem:[#allocation6 + $0xa8] sm:$0xff] }
 0x224   : > { %v733_v10 = vadd.f32 %v732_v8, %v534_v3  ;;  %v2105_v11 = vpop.f32.mrb[14].mxu0 }
 0x225   : > { %v744_v12 = vadd.f32 %v2105_v11, %v537_v6  ;;  %v735_v14 = vpop.f32.mrb[15].mxu0  ;;  %v825_v19 = vmax.f32 %v741_v7, 0.0 }
 0x226   : > { %v736_v15 = vadd.f32 %v735_v14, %v535_v9  ;;  %v823_v27 = vmax.f32 %v733_v10, 0.0  ;;  %v548_v14 = vld [vmem:[#allocation6 + $0xd0] sm:$0xff] }
 0x227   : > { %v826_v25 = vmax.f32 %v744_v12, 0.0 }
 0x228   : > { %v824_v28 = vmax.f32 %v736_v15, 0.0 }
 0x229   : > { %v3195_v34 = vpack.c.bf16 %v826_v25, %v825_v19  ;;  %v546_v19 = vld [vmem:[#allocation6 + $0xc0] sm:$0xff] }
 0x22a   : > { %v3197_v40 = vpack.c.bf16 %v824_v28, %v823_v27  ;;  %v2108_v41 = vpop.f32.mrb[16].mxu0  ;;  %v549_v28 = vld [vmem:[#allocation6 + $0xd8] sm:$0xff] }
 0x22b   : > { %v757_v43 = vadd.f32 %v2108_v41, %v540_v31  ;;  %v748_v44 = vpop.f32.mrb[17].mxu0  ;;  %v547_v41 = vld [vmem:[#allocation6 + $0xc8] sm:$0xff] }
 0x22c   : > { %v749_v46 = vadd.f32 %v748_v44, %v538_v37  ;;  %v2109_v47 = vpop.f32.mrb[18].mxu0 }
 0x22d   : > { %v760_v49 = vadd.f32 %v2109_v47, %v541_v42  ;;  %v751_v51 = vpop.f32.mrb[19].mxu0  ;;  %v829_v53 = vmax.f32 %v757_v43, 0.0 }
 0x22e   : > { %v752_v52 = vadd.f32 %v751_v51, %v539_v45  ;;  %v827_v55 = vmax.f32 %v749_v46, 0.0  ;;  %v552_v51 = vld [vmem:[#allocation6 + $0xf0] sm:$0xff] }
 0x22f   : > { %v830_v54 = vmax.f32 %v760_v49, 0.0 }
 0x230   : > { %v828_v56 = vmax.f32 %v752_v52, 0.0 }
 0x231   : > { %v868_v58 = vpack.c.bf16 %v830_v54, %v829_v53  ;;  %v550_v53 = vld [vmem:[#allocation6 + $0xe0] sm:$0xff] }
 0x232   : > { %v2112_v60 = vpop.f32.mrb[20].mxu0  ;;  %v867_v62 = vpack.c.bf16 %v828_v56, %v827_v55  ;;  %v553_v56 = vld [vmem:[#allocation6 + $0xf8] sm:$0xff] }
 0x233   : > { %v773_v63 = vadd.f32 %v2112_v60, %v544_v57  ;;  %v764_v0 = vpop.f32.mrb[21].mxu0 }
 0x234   : > { %v765_v3 = vadd.f32 %v764_v0, %v542_v59  ;;  %v2113_v5 = vpop.f32.mrb[22].mxu0  ;;  %1962 = vmatprep.subr.bf16.mxu1 %v867_v62  ;;  %v551_v59 = vld [vmem:[#allocation6 + $0xe8] sm:$0xff] }
 0x235   : > { %v776_v6 = vadd.f32 %v2113_v5, %v545_v61  ;;  %v767_v7 = vpop.f32.mrb[23].mxu0  ;;  %1963 = vmatpush3.bf16.msra.mxu1 %v3184_v21  ;;  %v833_v9 = vmax.f32 %v773_v63, 0.0 }
 0x236   : > { %v768_v8 = vadd.f32 %v767_v7, %v543_v1  ;;  %1964 = vmatprep.subr.bf16.mxu1 %v868_v58  ;;  %v831_v11 = vmax.f32 %v765_v3, 0.0  ;;  %v2368_v7 = vld [vmem:[#allocation9] ss:$8 sps:$4 sm:$0xff]  }
 0x237   : > { %v834_v10 = vmax.f32 %v776_v6, 0.0 }
 0x238   : > { %v832_v12 = vmax.f32 %v768_v8, 0.0  ;;  %v2371_v8 = vld [vmem:[#allocation9 + $0x14] ss:$8 sps:$4 sm:$0xff]  }
 0x239   : > { %v870_v15 = vpack.c.bf16 %v834_v10, %v833_v9  ;;  %1965 = vmatpush3.bf16.msra.mxu1 %v3182_v13  ;;  %v2374_v9 = vld [vmem:[#allocation9 + $0x24] ss:$8 sps:$4 sm:$0xff]   ;;  %v2376_v10 = vld [vmem:[#allocation9 + $0x20] ss:$8 sps:$4 sm:$0xff]  }
 0x23a   : > { %v869_v25 = vpack.c.bf16 %v832_v12, %v831_v11  ;;  %v2116_v27 = vpop.f32.mrb[24].mxu0  ;;  %v2377_v11 = vld [vmem:[#allocation9 + $0x34] ss:$8 sps:$4 sm:$0xff]   ;;  %v2380_v12 = vld [vmem:[#allocation9 + $0x44] ss:$8 sps:$4 sm:$0xff]  }
 0x23b   : > { %v789_v31 = vadd.f32 %v2116_v27, %v548_v14  ;;  %v780_v37 = vpop.f32.mrb[25].mxu0  ;;  %v2383_v14 = vld [vmem:[#allocation9 + $0x54] ss:$8 sps:$4 sm:$0xff]   ;;  %v2391_v27 = vld [vmem:[#allocation9 + $0x70] ss:$8 sps:$4 sm:$0xff]  }
 0x23c   : > { %v781_v42 = vadd.f32 %v780_v37, %v546_v19  ;;  %v2117_v43 = vpop.f32.mrb[26].mxu0  ;;  %1966 = vmatprep.subr.bf16.mxu1 %v869_v25  ;;  %v2388_v19 = vld [vmem:[#allocation9 + $0x60] ss:$8 sps:$4 sm:$0xff]   ;;  %v2389_v25 = vld [vmem:[#allocation9 + $0x74] ss:$8 sps:$4 sm:$0xff]  }
 0x23d   : > { %v792_v21 = vadd.f32 %v2117_v43, %v549_v28  ;;  %v783_v44 = vpop.f32.mrb[27].mxu0  ;;  %1967 = vmatpush3.bf16.msra.mxu1 %v3189_v50  ;;  %v837_v46 = vmax.f32 %v789_v31, 0.0  ;;  %v2396_v28 = vld [vmem:[%s3119_s13 + $0x20] sm:$0xff]   ;;  %v2397_v31 = vld [vmem:[%s3119_s13 + $0x28] sm:$0xff]   ;;  %v2398_v37 = vld [vmem:[%s3119_s13 + $0x30] sm:$0xff]  }
 0x23e   : > { %v784_v45 = vadd.f32 %v783_v44, %v547_v41  ;;  %1968 = vmatprep.subr.bf16.mxu1 %v870_v15  ;;  %v835_v49 = vmax.f32 %v781_v42, 0.0  ;;  %v2386_v15 = vld [vmem:[#allocation9 + $0x64] ss:$8 sps:$4 sm:$0xff]   ;;  %2130 = vmatprep.subr.bf16.mxu0 %v2396_v28  ;;  %v2400_v42 = vld [vmem:[%s3119_s13 + $0x40] sm:$0xff]   ;;  %v2401_v43 = vld [vmem:[%s3119_s13 + $0x48] sm:$0xff]  }
 0x23f   : > { %v838_v47 = vmax.f32 %v792_v21, 0.0  ;;  %2131 = vmatpush3.bf16.msra.mxu0 %v2396_v28  ;;  %v2399_v41 = vld [vmem:[%s3119_s13 + $0x38] sm:$0xff]   ;;  %v2402_v21 = vld [vmem:[%s3119_s13 + $0x50] sm:$0xff]  }
 0x240   : > { %v836_v13 = vmax.f32 %v784_v45, 0.0  ;;  %2132 = vmatprep.subr.bf16.mxu0 %v2397_v31  ;;  %v2403_v44 = vld [vmem:[%s3119_s13 + $0x58] sm:$0xff]   ;;  %v2404_v45 = vld [vmem:[%s3119_s13 + $0x60] sm:$0xff]  }
 0x241   : > { %v872_v52 = vpack.c.bf16 %v838_v47, %v837_v46  ;;  %1969 = vmatpush3.bf16.msra.mxu1 %v3187_v48  ;;  %v2405_v46 = vld [vmem:[%s3119_s13 + $0x68] sm:$0xff]   ;;  %v1052_v47 = vlaneseq }
 0x242   : > { %v871_v54 = vpack.c.bf16 %v836_v13, %v835_v49  ;;  %v2120_v55 = vpop.f32.mrb[28].mxu0 }
 0x243   : > { %v805_v57 = vadd.f32 %v2120_v55, %v552_v51  ;;  %v796_v58 = vpop.f32.mrb[29].mxu0  ;;  %2133 = vmatpush3.bf16.msra.mxu0 %v2397_v31  ;;  %v3217_v49 = vshrl.u32 %v1052_v47, 7  ;;  %v3222_v51 = vld [vmem:[%s378_s1] sm:$0xff] }
 0x244   : > { %v797_v60 = vadd.f32 %v796_v58, %v550_v53  ;;  %v2121_v61 = vpop.f32.mrb[30].mxu0  ;;  %1970 = vmatprep.subr.bf16.mxu1 %v871_v54  ;;  %2134 = vmatprep.subr.bf16.mxu0 %v2398_v37 }
 0x245   : > { %v808_v50 = vadd.f32 %v2121_v61, %v553_v56  ;;  %v799_v62 = vpop.f32.mrb[31].mxu0  ;;  %1971 = vmatpush3.bf16.msra.mxu1 %v3193_v4  ;;  %v841_v0 = vmax.f32 %v805_v57, 0.0  ;;  %v2373_v4 = vld [vmem:[#allocation9 + $0x10] ss:$8 sps:$4 sm:$0xff]   ;;  %v1054_v13 = vsub.s32 0, %v3217_v49 }
 0x246   : > { %v800_v63 = vadd.f32 %v799_v62, %v551_v59  ;;  %1972 = vmatprep.subr.bf16.mxu1 %v872_v52  ;;  %v839_v3 = vmax.f32 %v797_v60, 0.0 }
 0x247   : > { %v842_v1 = vmax.f32 %v808_v50, 0.0  ;;  %2135 = vmatpush3.bf16.msra.mxu0 %v2398_v37  ;;  %v3225_v52 = vrot.slane %v3222_v51, %v1054_v13 }
 0x248   : > { %v840_v48 = vmax.f32 %v800_v63, 0.0  ;;  %2136 = vmatprep.subr.bf16.mxu0 %v2399_v41 }
 0x249   : > { %v874_v5 = vpack.c.bf16 %v842_v1, %v841_v0  ;;  %1973 = vmatpush3.bf16.msra.mxu1 %v3191_v2  ;;  %v2379_v2 = vld [vmem:[#allocation9 + $0x30] ss:$8 sps:$4 sm:$0xff]   ;;  %v1056_v56 = vmul.f32 %v3225_v52, %v3131_v16  ;;  %v1057_v58 = vmul.f32 %v3225_v52, %v3133_v17  ;;  %v1059_v16 = vmul.f32 %v3225_v52, %v3139_v20 }
 0x24a   : > { %v873_v6 = vpack.c.bf16 %v840_v48, %v839_v3  ;;  %v1058_v3 = vmul.f32 %v3225_v52, %v3135_v18  ;;  %v1061_v18 = vmul.f32 %v3225_v52, %v3145_v23 }
 0x24b   : > { %2137 = vmatpush3.bf16.msra.mxu0 %v2399_v41 }
 0x24c   : > { %1974 = vmatprep.subr.bf16.mxu1 %v873_v6 }
 0x24d   : > { %1975 = vmatpush3.bf16.msra.mxu1 %v3197_v40  ;;  %v2382_v40 = vld [vmem:[#allocation9 + $0x40] ss:$8 sps:$4 sm:$0xff]  }
 0x24e   : > { %1976 = vmatprep.subr.bf16.mxu1 %v874_v5 }
 0x251   : > { %1977 = vmatpush3.bf16.msra.mxu1 %v3195_v34  ;;  %v2385_v34 = vld [vmem:[#allocation9 + $0x50] ss:$8 sps:$4 sm:$0xff]  }
 0x252   : > { %2154 = vmatprep.subr.bf16.mxu1 %v2400_v42 }
 0x254   : > { %988 = vmatmul.mubr.bf16.vlgmr.msra.gmra.mrb[0].mxu1 %v2368_v7 }
 0x255   : > { %995 = vmatprep.mubr.bf16.mxu1 %v2371_v8  ;;  %2155 = vmatpush3.bf16.msra.mxu1 %v2400_v42 }
 0x256   : > { %2156 = vmatprep.subr.bf16.mxu1 %v2401_v43 }
 0x259   : > { %2157 = vmatpush3.bf16.msra.mxu1 %v2401_v43 }
 0x25a   : > { %2158 = vmatprep.subr.bf16.mxu1 %v2402_v21 }
 0x25c   : > { %996 = vmatmul.mubr.bf16.gmra.mrb[4].mxu1 %v2373_v4 }
 0x25d   : > { %1003 = vmatprep.mubr.bf16.mxu1 %v2374_v9  ;;  %2159 = vmatpush3.bf16.msra.mxu1 %v2402_v21 }
 0x25e   : > { %2160 = vmatprep.subr.bf16.mxu1 %v2403_v44 }
 0x261   : > { %2161 = vmatpush3.bf16.msra.mxu1 %v2403_v44 }
 0x262   : > { %2162 = vmatprep.subr.bf16.mxu1 %v2404_v45 }
 0x264   : > { %1004 = vmatmul.mubr.bf16.gmra.mrb[8].mxu1 %v2376_v10 }
 0x265   : > { %1011 = vmatprep.mubr.bf16.mxu1 %v2377_v11  ;;  %2163 = vmatpush3.bf16.msra.mxu1 %v2404_v45  ;;  %v1060_v11 = vmul.f32 %v3225_v52, %v3143_v22  ;;  %v1063_v22 = vmul.f32 %v3225_v52, %v3151_v26  ;;  %v1064_v45 = vmul.f32 %v3225_v52, %v3155_v29 }
 0x266   : > { %2164 = vmatprep.subr.bf16.mxu1 %v2405_v46  ;;  %v1067_v29 = vmul.f32 %v3225_v52, %v3163_v33 }
 0x269   : > { %2165 = vmatpush3.bf16.msra.mxu1 %v2405_v46 }
 0x26c   : > { %1012 = vmatmul.mubr.bf16.gmra.mrb[12].mxu1 %v2379_v2 }
 0x26d   : > { %1019 = vmatprep.mubr.bf16.mxu1 %v2380_v12 }
 0x274   : > { %1020 = vmatmul.mubr.bf16.gmra.mrb[16].mxu1 %v2382_v40 }
 0x275   : > { %1027 = vmatprep.mubr.bf16.mxu1 %v2383_v14 }
 0x27c   : > { %1028 = vmatmul.mubr.bf16.gmra.mrb[20].mxu1 %v2385_v34 }
 0x27d   : > { %1035 = vmatprep.mubr.bf16.mxu1 %v2386_v15 }
 0x284   : > { %1036 = vmatmul.mubr.bf16.gmra.mrb[24].mxu1 %v2388_v19 }
 0x285   : > { %1043 = vmatprep.mubr.bf16.mxu1 %v2389_v25 }
 0x28c   : > { %1044 = vmatmul.mubr.bf16.gmra.mrb[28].mxu1 %v2391_v27  ;;  %v1062_v27 = vmul.f32 %v3225_v52, %v3147_v24  ;;  %v1065_v24 = vmul.f32 %v3225_v52, %v3157_v30 }
 0x327   : > { %v1978_v53 = vpop.f32.mrb[0].mxu1 }
 0x328   : > { %v1979_v54 = vpop.f32.mrb[1].mxu1 }
 0x329   : > { %v1980_v55 = vadd.f32 %v1979_v54, %v1978_v53  ;;  %v1981_v57 = vpop.f32.mrb[2].mxu1 }
 0x32a   : > { %v1982_v59 = vpop.f32.mrb[3].mxu1 }
 0x32b   : > { %v1983_v60 = vadd.f32 %v1982_v59, %v1981_v57  ;;  %v1072_v61 = vadd.f32 %v1980_v55, %v1056_v56 }
 0x32d   : > { %v1073_v50 = vadd.f32 %v1983_v60, %v1057_v58  ;;  %v1066_v58 = vmul.f32 %v3225_v52, %v3161_v32  ;;  %v1069_v32 = vmul.f32 %v3225_v52, %v3169_v36 }
 0x32f   : > { %v1984_v62 = vpop.f32.mrb[4].mxu1  ;;  %v1088_v63 = vpack.c.bf16 %v1073_v50, %v1072_v61 }
 0x330   : > { %v1985_v0 = vpop.f32.mrb[5].mxu1 }
 0x331   : > { %v1986_v1 = vadd.f32 %v1985_v0, %v1984_v62  ;;  %v1987_v48 = vpop.f32.mrb[6].mxu1  ;;  %2138 = vmatprep.mubr.bf16.mxu0 %v1088_v63 }
 0x332   : > { %v1988_v5 = vpop.f32.mrb[7].mxu1 }
 0x333   : > { %v1989_v6 = vadd.f32 %v1988_v5, %v1987_v48  ;;  %v1074_v7 = vadd.f32 %v1986_v1, %v1058_v3  ;;  %v1068_v3 = vmul.f32 %v3225_v52, %v3167_v35  ;;  %v1071_v35 = vmul.f32 %v3225_v52, %v3175_v39 }
 0x335   : > { %v1075_v17 = vadd.f32 %v1989_v6, %v1059_v16 }
 0x337   : > { %v1089_v8 = vpack.c.bf16 %v1075_v17, %v1074_v7  ;;  %v1990_v4 = vpop.f32.mrb[8].mxu1 }
 0x338   : > { %v1991_v9 = vpop.f32.mrb[9].mxu1 }
 0x339   : > { %v1992_v10 = vadd.f32 %v1991_v9, %v1990_v4  ;;  %v1993_v2 = vpop.f32.mrb[10].mxu1  ;;  %2139 = vmatmul.mubr.bf16.vlgmr.msra.gmra.mrb[32].mxu0 %v1089_v8  ;;  %v1070_v9 = vmul.f32 %v3225_v52, %v3173_v38 }
 0x33a   : > { %v1994_v12 = vpop.f32.mrb[11].mxu1 }
 0x33b   : > { %v1995_v40 = vadd.f32 %v1994_v12, %v1993_v2  ;;  %v1076_v14 = vadd.f32 %v1992_v10, %v1060_v11 }
 0x33d   : > { %v1077_v20 = vadd.f32 %v1995_v40, %v1061_v18  ;;  %v2406_v40 = vld [vmem:[%s3119_s13 + $0x70] sm:$0xff]  }
 0x33e   : > { %2166 = vmatprep.subr.bf16.mxu1 %v2406_v40 }
 0x33f   : > { %v1996_v34 = vpop.f32.mrb[12].mxu1  ;;  %v1090_v15 = vpack.c.bf16 %v1077_v20, %v1076_v14  ;;  %2167 = vmatpush3.bf16.msra.mxu1 %v2406_v40  ;;  %v2407_v14 = vld [vmem:[%s3119_s13 + $0x78] sm:$0xff]   ;;  %v1114_v20 = vsub.s32 1, %v3217_v49 }
 0x340   : > { %v1997_v19 = vpop.f32.mrb[13].mxu1  ;;  %2168 = vmatprep.subr.bf16.mxu1 %v2407_v14 }
 0x341   : > { %v1998_v25 = vadd.f32 %v1997_v19, %v1996_v34  ;;  %v1999_v28 = vpop.f32.mrb[14].mxu1  ;;  %2142 = vmatprep.mubr.bf16.mxu0 %v1090_v15  ;;  %v1115_v38 = vrot.slane %v3222_v51, %v1114_v20 }
 0x342   : > { %v2000_v31 = vpop.f32.mrb[15].mxu1 }
 0x343   : > { %v2001_v37 = vadd.f32 %v2000_v31, %v1999_v28  ;;  %v1078_v41 = vadd.f32 %v1998_v25, %v1062_v27  ;;  %2169 = vmatpush3.bf16.msra.mxu1 %v2407_v14 }
 0x345   : > { %v1079_v23 = vadd.f32 %v2001_v37, %v1063_v22 }
 0x347   : > { %v2002_v42 = vpop.f32.mrb[16].mxu1  ;;  %v1091_v43 = vpack.c.bf16 %v1079_v23, %v1078_v41 }
 0x348   : > { %v2003_v21 = vpop.f32.mrb[17].mxu1 }
 0x349   : > { %v2004_v44 = vadd.f32 %v2003_v21, %v2002_v42  ;;  %v2005_v46 = vpop.f32.mrb[18].mxu1  ;;  %2143 = vmatmul.mubr.bf16.gmra.mrb[36].mxu0 %v1091_v43 }
 0x34a   : > { %v2006_v47 = vpop.f32.mrb[19].mxu1 }
 0x34b   : > { %v2007_v13 = vadd.f32 %v2006_v47, %v2005_v46  ;;  %v1080_v53 = vadd.f32 %v2004_v44, %v1064_v45 }
 0x34d   : > { %v1081_v26 = vadd.f32 %v2007_v13, %v1065_v24 }
 0x34f   : > { %v2008_v54 = vpop.f32.mrb[20].mxu1  ;;  %v1092_v55 = vpack.c.bf16 %v1081_v26, %v1080_v53 }
 0x350   : > { %v2009_v56 = vpop.f32.mrb[21].mxu1 }
 0x351   : > { %v2010_v57 = vadd.f32 %v2009_v56, %v2008_v54  ;;  %v2011_v59 = vpop.f32.mrb[22].mxu1  ;;  %2146 = vmatprep.mubr.bf16.mxu0 %v1092_v55 }
 0x352   : > { %v2012_v60 = vpop.f32.mrb[23].mxu1 }
 0x353   : > { %v2013_v61 = vadd.f32 %v2012_v60, %v2011_v59  ;;  %v1082_v50 = vadd.f32 %v2010_v57, %v1066_v58 }
 0x355   : > { %v1083_v30 = vadd.f32 %v2013_v61, %v1067_v29 }
 0x357   : > { %v2014_v62 = vpop.f32.mrb[24].mxu1  ;;  %v1093_v63 = vpack.c.bf16 %v1083_v30, %v1082_v50 }
 0x358   : > { %v2015_v0 = vpop.f32.mrb[25].mxu1 }
 0x359   : > { %v2016_v1 = vadd.f32 %v2015_v0, %v2014_v62  ;;  %v2017_v48 = vpop.f32.mrb[26].mxu1  ;;  %2147 = vmatmul.mubr.bf16.gmra.mrb[40].mxu0 %v1093_v63 }
 0x35a   : > { %v2018_v16 = vpop.f32.mrb[27].mxu1 }
 0x35b   : > { %v2019_v5 = vadd.f32 %v2018_v16, %v2017_v48  ;;  %v1084_v6 = vadd.f32 %v2016_v1, %v1068_v3 }
 0x35d   : > { %v1085_v33 = vadd.f32 %v2019_v5, %v1069_v32 }
 0x35f   : > { %v2020_v7 = vpop.f32.mrb[28].mxu1  ;;  %v1094_v17 = vpack.c.bf16 %v1085_v33, %v1084_v6 }
 0x360   : > { %v2021_v8 = vpop.f32.mrb[29].mxu1 }
 0x361   : > { %v2022_v4 = vadd.f32 %v2021_v8, %v2020_v7  ;;  %v2023_v10 = vpop.f32.mrb[30].mxu1  ;;  %2150 = vmatprep.mubr.bf16.mxu0 %v1094_v17 }
 0x362   : > { %v2024_v11 = vpop.f32.mrb[31].mxu1 }
 0x363   : > { %v2025_v36 = vadd.f32 %v2024_v11, %v2023_v10  ;;  %v1086_v2 = vadd.f32 %v2022_v4, %v1070_v9 }
 0x365   : > { %v1087_v18 = vadd.f32 %v2025_v36, %v1071_v35 }
 0x367   : > { %v1095_v12 = vpack.c.bf16 %v1087_v18, %v1086_v2  ;;  %v1304_v18 = vsub.s32 2, %v3217_v49 }
 0x369   : > { %2151 = vmatmul.mubr.bf16.gmra.mrb[44].mxu0 %v1095_v12  ;;  %v3265_v12 = vrot.slane %v3222_v51, %v1304_v18  ;;  %v2409_v51 = vld [vmem:[#allocation2] sm:$0xff] }
 0x40c   : > { %v2140_v34 = vpop.f32.mrb[32].mxu0 }
 0x40d   : > { %v1207_v15 = vadd.f32 %v2140_v34, %v1115_v38  ;;  %v1198_v19 = vpop.f32.mrb[33].mxu0 }
 0x40e   : > { %v1199_v39 = vadd.f32 %v1198_v19, %v1115_v38  ;;  %v2141_v52 = vpop.f32.mrb[34].mxu0 }
 0x40f   : > { %v1210_v25 = vadd.f32 %v2141_v52, %v1115_v38  ;;  %v1201_v27 = vpop.f32.mrb[35].mxu0  ;;  %v1263_v22 = vmax.f32 %v1207_v15, 0.0 }
 0x410   : > { %v1202_v28 = vadd.f32 %v1201_v27, %v1115_v38  ;;  %v1261_v37 = vmax.f32 %v1199_v39, 0.0  ;;  %v2408_v27 = vld [vmem:[#allocation2 + $0x10] sm:$0xff] }
 0x411   : > { %v1264_v31 = vmax.f32 %v1210_v25, 0.0 }
 0x412   : > { %v1262_v41 = vmax.f32 %v1202_v28, 0.0 }
 0x413   : > { %v1278_v23 = vpack.c.bf16 %v1264_v31, %v1263_v22 }
 0x414   : > { %v1277_v42 = vpack.c.bf16 %v1262_v41, %v1261_v37  ;;  %v2410_v37 = vld [vmem:[#allocation2 + $0x18] sm:$0xff] }
 0x416   : > { %2170 = vmatprep.mubr.bf16.mxu1 %v1277_v42 }
 0x417   : > { %2171 = vmatmul.mubr.bf16.vlgmr.msra.gmra.mrb[32].mxu1 %v1278_v23  ;;  %v2411_v23 = vld [vmem:[#allocation2 + $0x8] sm:$0xff] }
 0x41c   : > { %v2144_v43 = vpop.f32.mrb[36].mxu0 }
 0x41d   : > { %v1223_v21 = vadd.f32 %v2144_v43, %v1115_v38  ;;  %v1214_v44 = vpop.f32.mrb[37].mxu0 }
 0x41e   : > { %v1215_v45 = vadd.f32 %v1214_v44, %v1115_v38  ;;  %v2145_v46 = vpop.f32.mrb[38].mxu0 }
 0x41f   : > { %v1226_v24 = vadd.f32 %v2145_v46, %v1115_v38  ;;  %v1217_v47 = vpop.f32.mrb[39].mxu0  ;;  %v1267_v53 = vmax.f32 %v1223_v21, 0.0 }
 0x420   : > { %v1218_v13 = vadd.f32 %v1217_v47, %v1115_v38  ;;  %v1265_v54 = vmax.f32 %v1215_v45, 0.0 }
 0x421   : > { %v1268_v26 = vmax.f32 %v1226_v24, 0.0 }
 0x422   : > { %v1266_v55 = vmax.f32 %v1218_v13, 0.0 }
 0x423   : > { %v1280_v56 = vpack.c.bf16 %v1268_v26, %v1267_v53 }
 0x424   : > { %v1279_v57 = vpack.c.bf16 %v1266_v55, %v1265_v54  ;;  %v2412_v54 = vld [vmem:[#allocation2 + $0x30] sm:$0xff] }
 0x426   : > { %2174 = vmatprep.mubr.bf16.mxu1 %v1279_v57  ;;  %v2413_v57 = vld [vmem:[#allocation2 + $0x20] sm:$0xff] }
 0x427   : > { %2175 = vmatmul.mubr.bf16.gmra.mrb[36].mxu1 %v1280_v56 }
 0x42c   : > { %v2148_v58 = vpop.f32.mrb[40].mxu0 }
 0x42d   : > { %v1239_v59 = vadd.f32 %v2148_v58, %v1115_v38  ;;  %v1230_v29 = vpop.f32.mrb[41].mxu0 }
 0x42e   : > { %v1231_v60 = vadd.f32 %v1230_v29, %v1115_v38  ;;  %v2149_v61 = vpop.f32.mrb[42].mxu0  ;;  %v2414_v29 = vld [vmem:[#allocation2 + $0x38] sm:$0xff] }
 0x42f   : > { %v1242_v50 = vadd.f32 %v2149_v61, %v1115_v38  ;;  %v1233_v30 = vpop.f32.mrb[43].mxu0  ;;  %v1271_v63 = vmax.f32 %v1239_v59, 0.0  ;;  %v2415_v61 = vld [vmem:[#allocation2 + $0x28] sm:$0xff] }
 0x430   : > { %v1234_v62 = vadd.f32 %v1233_v30, %v1115_v38  ;;  %v1269_v1 = vmax.f32 %v1231_v60, 0.0 }
 0x431   : > { %v1272_v0 = vmax.f32 %v1242_v50, 0.0 }
 0x432   : > { %v1270_v3 = vmax.f32 %v1234_v62, 0.0 }
 0x433   : > { %v1282_v48 = vpack.c.bf16 %v1272_v0, %v1271_v63 }
 0x434   : > { %v1281_v32 = vpack.c.bf16 %v1270_v3, %v1269_v1 }
 0x436   : > { %2178 = vmatprep.mubr.bf16.mxu1 %v1281_v32 }
 0x437   : > { %2179 = vmatmul.mubr.bf16.gmra.mrb[40].mxu1 %v1282_v48 }
 0x43c   : > { %v2152_v16 = vpop.f32.mrb[44].mxu0 }
 0x43d   : > { %v1255_v5 = vadd.f32 %v2152_v16, %v1115_v38  ;;  %v1246_v6 = vpop.f32.mrb[45].mxu0 }
 0x43e   : > { %v1247_v33 = vadd.f32 %v1246_v6, %v1115_v38  ;;  %v2153_v7 = vpop.f32.mrb[46].mxu0  ;;  %v2416_v6 = vld [vmem:[#allocation2 + $0x50] sm:$0xff] }
 0x43f   : > { %v1258_v17 = vadd.f32 %v2153_v7, %v1115_v38  ;;  %v1249_v8 = vpop.f32.mrb[47].mxu0  ;;  %v1275_v9 = vmax.f32 %v1255_v5, 0.0 }
 0x440   : > { %v1250_v4 = vadd.f32 %v1249_v8, %v1115_v38  ;;  %v1273_v35 = vmax.f32 %v1247_v33, 0.0 }
 0x441   : > { %v1276_v10 = vmax.f32 %v1258_v17, 0.0  ;;  %v2417_v17 = vld [vmem:[#allocation2 + $0x40] sm:$0xff] }
 0x442   : > { %v1274_v11 = vmax.f32 %v1250_v4, 0.0 }
 0x443   : > { %v1284_v36 = vpack.c.bf16 %v1276_v10, %v1275_v9  ;;  %v2418_v9 = vld [vmem:[#allocation2 + $0x58] sm:$0xff] }
 0x444   : > { %v1283_v2 = vpack.c.bf16 %v1274_v11, %v1273_v35  ;;  %v2419_v35 = vld [vmem:[#allocation2 + $0x48] sm:$0xff] }
 0x446   : > { %2182 = vmatprep.mubr.bf16.mxu1 %v1283_v2 }
 0x447   : > { %2183 = vmatmul.mubr.bf16.gmra.mrb[44].mxu1 %v1284_v36 }
 0x4ea   : > { %v2172_v40 = vpop.f32.mrb[32].mxu1 }
 0x4eb   : > { %v1397_v14 = vadd.f32 %v2172_v40, %v3265_v12  ;;  %v1388_v20 = vpop.f32.mrb[33].mxu1 }
 0x4ec   : > { %v1389_v34 = vadd.f32 %v1388_v20, %v3265_v12  ;;  %v2173_v38 = vpop.f32.mrb[34].mxu1 }
 0x4ed   : > { %v1453_v15 = vmax.f32 %v1397_v14, 0.0  ;;  %v1400_v19 = vadd.f32 %v2173_v38, %v3265_v12  ;;  %v1391_v39 = vpop.f32.mrb[35].mxu1 }
 0x4ee   : > { %v1451_v52 = vmax.f32 %v1389_v34, 0.0  ;;  %v1392_v25 = vadd.f32 %v1391_v39, %v3265_v12  ;;  %v2420_v39 = vld [vmem:[#allocation2 + $0x70] sm:$0xff] }
 0x4ef   : > { %v3271_v28 = vadd.f32 %v2408_v27, %v1453_v15  ;;  %v1454_v49 = vmax.f32 %v1400_v19, 0.0  ;;  %v2421_v27 = vld [vmem:[#allocation2 + $0x60] sm:$0xff] }
 0x4f0   : > { %v3273_v22 = vadd.f32 %v2409_v51, %v1451_v52  ;;  %v1452_v31 = vmax.f32 %v1392_v25, 0.0 }
 0x4f1   : > { %v3275_v41 = vadd.f32 %v2410_v37, %v1454_v49  ;;  %1489 = vst [vmem:[#allocation2 + $0x10] sm:$0xff] (!%p1922_p5), %v3271_v28 }
 0x4f2   : > { %v3277_v42 = vadd.f32 %v2411_v23, %v1452_v31  ;;  %v2422_v31 = vld [vmem:[#allocation2 + $0x78] sm:$0xff]  ;;  %v2423_v23 = vld [vmem:[#allocation2 + $0x68] sm:$0xff]  ;;  %1487 = vst [vmem:[#allocation2] sm:$0xff] (!%p1922_p5), %v3273_v22 }
 0x4f3   : > { %1490 = vst [vmem:[#allocation2 + $0x18] sm:$0xff] (!%p1922_p5), %v3275_v41 }
 0x4f4   : > { %1488 = vst [vmem:[#allocation2 + $0x8] sm:$0xff] (!%p1922_p5), %v3277_v42 }
 0x4fa   : > { %v2176_v43 = vpop.f32.mrb[36].mxu1 }
 0x4fb   : > { %v1413_v21 = vadd.f32 %v2176_v43, %v3265_v12  ;;  %v1404_v44 = vpop.f32.mrb[37].mxu1 }
 0x4fc   : > { %v1405_v45 = vadd.f32 %v1404_v44, %v3265_v12  ;;  %v2177_v46 = vpop.f32.mrb[38].mxu1 }
 0x4fd   : > { %v1457_v24 = vmax.f32 %v1413_v21, 0.0  ;;  %v1416_v47 = vadd.f32 %v2177_v46, %v3265_v12  ;;  %v1407_v13 = vpop.f32.mrb[39].mxu1 }
 0x4fe   : > { %v1455_v53 = vmax.f32 %v1405_v45, 0.0  ;;  %v1408_v26 = vadd.f32 %v1407_v13, %v3265_v12 }
 0x4ff   : > { %v3283_v55 = vadd.f32 %v2412_v54, %v1457_v24  ;;  %v1458_v56 = vmax.f32 %v1416_v47, 0.0 }
 0x500   : > { %v3285_v58 = vadd.f32 %v2413_v57, %v1455_v53  ;;  %v1456_v59 = vmax.f32 %v1408_v26, 0.0 }
 0x501   : > { %v3287_v60 = vadd.f32 %v2414_v29, %v1458_v56  ;;  %1493 = vst [vmem:[#allocation2 + $0x30] sm:$0xff] (!%p1922_p5), %v3283_v55 }
 0x502   : > { %v3289_v50 = vadd.f32 %v2415_v61, %v1456_v59  ;;  %1491 = vst [vmem:[#allocation2 + $0x20] sm:$0xff] (!%p1922_p5), %v3285_v58 }
 0x503   : > { %1494 = vst [vmem:[#allocation2 + $0x38] sm:$0xff] (!%p1922_p5), %v3287_v60 }
 0x504   : > { %1492 = vst [vmem:[#allocation2 + $0x28] sm:$0xff] (!%p1922_p5), %v3289_v50 }
 0x50a   : > { %v2180_v30 = vpop.f32.mrb[40].mxu1 }
 0x50b   : > { %v1429_v62 = vadd.f32 %v2180_v30, %v3265_v12  ;;  %v1420_v63 = vpop.f32.mrb[41].mxu1 }
 0x50c   : > { %v1421_v0 = vadd.f32 %v1420_v63, %v3265_v12  ;;  %v2181_v1 = vpop.f32.mrb[42].mxu1 }
 0x50d   : > { %v1461_v3 = vmax.f32 %v1429_v62, 0.0  ;;  %v1432_v48 = vadd.f32 %v2181_v1, %v3265_v12  ;;  %v1423_v32 = vpop.f32.mrb[43].mxu1 }
 0x50e   : > { %v1459_v16 = vmax.f32 %v1421_v0, 0.0  ;;  %v1424_v5 = vadd.f32 %v1423_v32, %v3265_v12 }
 0x50f   : > { %v3295_v33 = vadd.f32 %v2416_v6, %v1461_v3  ;;  %v1462_v7 = vmax.f32 %v1432_v48, 0.0 }
 0x510   : > { %v1475_v8 = vadd.f32 %v2417_v17, %v1459_v16  ;;  %v1460_v4 = vmax.f32 %v1424_v5, 0.0 }
 0x511   : > { %v3297_v10 = vadd.f32 %v2418_v9, %v1462_v7  ;;  %1497 = vst [vmem:[#allocation2 + $0x50] sm:$0xff] (!%p1922_p5), %v3295_v33 }
 0x512   : > { %v1476_v11 = vadd.f32 %v2419_v35, %v1460_v4  ;;  %1495 = vst [vmem:[#allocation2 + $0x40] sm:$0xff] (!%p1922_p5), %v1475_v8 }
 0x513   : > { %1498 = vst [vmem:[#allocation2 + $0x58] sm:$0xff] (!%p1922_p5), %v3297_v10 }
 0x514   : > { %1496 = vst [vmem:[#allocation2 + $0x48] sm:$0xff] (!%p1922_p5), %v1476_v11 }
 0x51a   : > { %v2184_v36 = vpop.f32.mrb[44].mxu1 }
 0x51b   : > { %v1445_v2 = vadd.f32 %v2184_v36, %v3265_v12  ;;  %v1436_v18 = vpop.f32.mrb[45].mxu1 }
 0x51c   : > { %v1437_v40 = vadd.f32 %v1436_v18, %v3265_v12  ;;  %v2185_v14 = vpop.f32.mrb[46].mxu1  ;;  %1486 = sbr.rel (%p1922_p5) target bundleno = 1317 (0x525), region = 92 }
 0x51d   : > { %v1465_v20 = vmax.f32 %v1445_v2, 0.0  ;;  %v1448_v34 = vadd.f32 %v2185_v14, %v3265_v12  ;;  %v1439_v38 = vpop.f32.mrb[47].mxu1 }
 0x51e   : > { %v1463_v15 = vmax.f32 %v1437_v40, 0.0  ;;  %v1440_v19 = vadd.f32 %v1439_v38, %v3265_v12 }
 0x51f   : > { %v3303_v52 = vadd.f32 %v2420_v39, %v1465_v20  ;;  %v1466_v25 = vmax.f32 %v1448_v34, 0.0 }
 0x520   : > { %v3305_v49 = vadd.f32 %v2421_v27, %v1463_v15  ;;  %v1464_v51 = vmax.f32 %v1440_v19, 0.0 }
 0x521   : > { %v3307_v37 = vadd.f32 %v2422_v31, %v1466_v25  ;;  %1501 = vst [vmem:[#allocation2 + $0x70] sm:$0xff] (!%p1922_p5), %v3303_v52 }
 0x522   : > { %v3309_v43 = vadd.f32 %v2423_v23, %v1464_v51  ;;  %1499 = vst [vmem:[#allocation2 + $0x60] sm:$0xff] (!%p1922_p5), %v3305_v49 }
 0x523   : > { %1502 = vst [vmem:[#allocation2 + $0x78] sm:$0xff] %v3307_v37 }
 0x524   : > { %1500 = vst [vmem:[#allocation2 + $0x68] sm:$0xff] %v3309_v43 }
 0x525 PF: > { %p1923_p2 = scmp.ne.s32.totalorder %s2827_s11, 2 }
 0x526   : > { %v2424_v12 = vld [vmem:[#allocation13] sm:$0xff] (!%p1923_p2)   ;;  %v2425_v21 = vld [vmem:[#allocation13 + $0x8] sm:$0xff] (!%p1923_p2)   ;;  %v1507_v44 = vpack.c.bf16 (!%p1923_p2), %v3277_v42, %v3273_v22  ;;  %v1511_v45 = vpack.c.bf16 (!%p1923_p2), %v1476_v11, %v1475_v8  ;;  %v2426_v46 = vld [vmem:[#allocation13 + $0x10] sm:$0xff] (!%p1923_p2)   ;;  %v1508_v53 = vpack.c.bf16 (!%p1923_p2), %v3275_v41, %v3271_v28  ;;  %v1512_v26 = vpack.c.bf16 (!%p1923_p2), %v3297_v10, %v3295_v33 }
 0x527   : > { %1506 = sbr.rel (%p1923_p2) target bundleno = 1577 (0x629), region = 96  ;;  %2186 = vmatprep.subr.bf16.mxu0 (!%p1923_p2), %v2424_v12  ;;  %2218 = vmatprep.subr.bf16.mxu1 (!%p1923_p2), %v2424_v12  ;;  %v2427_v24 = vld [vmem:[#allocation13 + $0x18] sm:$0xff] (!%p1923_p2)   ;;  %v2428_v22 = vld [vmem:[#allocation13 + $0x20] sm:$0xff] (!%p1923_p2)   ;;  %v2429_v42 = vld [vmem:[#allocation13 + $0x28] sm:$0xff] (!%p1923_p2)   ;;  %v1509_v54 = vpack.c.bf16 (!%p1923_p2), %v3289_v50, %v3285_v58  ;;  %v1513_v56 = vpack.c.bf16 (!%p1923_p2), %v3309_v43, %v3305_v49  ;;  %v1510_v57 = vpack.c.bf16 (!%p1923_p2), %v3287_v60, %v3283_v55 }
 0x528   : > { %2187 = vmatpush3.bf16.msra.mxu0 (!%p1923_p2), %v2424_v12  ;;  %2226 = vmatpush3.bf16.msra.mxu1 (!%p1923_p2), %v2424_v12  ;;  %v2430_v47 = vld [vmem:[#allocation13 + $0x30] sm:$0xff] (!%p1923_p2)   ;;  %v2431_v13 = vld [vmem:[#allocation13 + $0x38] sm:$0xff] (!%p1923_p2)   ;;  %v1514_v28 = vpack.c.bf16 (!%p1923_p2), %v3307_v37, %v3303_v52  ;;  %v1924_v41 = vld [vmem:[#allocation14] ss:$0 sm:$0xff] (!%p1923_p2) }
 0x529   : > { %2188 = vmatprep.subr.bf16.mxu0 (!%p1923_p2), %v2425_v21  ;;  %2219 = vmatprep.subr.bf16.mxu1 (!%p1923_p2), %v2425_v21 }
 0x52a   : > { %2202 = vmatprep.mubr.bf16.mxu0 (!%p1923_p2), %v1507_v44  ;;  %2210 = vmatprep.mubr.bf16.mxu1 (!%p1923_p2), %v1511_v45 }
 0x52c   : > { %2189 = vmatpush3.bf16.msra.mxu0 (!%p1923_p2), %v2425_v21  ;;  %2227 = vmatpush3.bf16.msra.mxu1 (!%p1923_p2), %v2425_v21 }
 0x52d   : > { %2190 = vmatprep.subr.bf16.mxu0 (!%p1923_p2), %v2426_v46  ;;  %2220 = vmatprep.subr.bf16.mxu1 (!%p1923_p2), %v2426_v46 }
 0x530   : > { %2191 = vmatpush3.bf16.msra.mxu0 %v2426_v46  ;;  %2228 = vmatpush3.bf16.msra.mxu1 %v2426_v46 }
 0x531   : > { %2192 = vmatprep.subr.bf16.mxu0 %v2427_v24  ;;  %2221 = vmatprep.subr.bf16.mxu1 %v2427_v24 }
 0x534   : > { %2193 = vmatpush3.bf16.msra.mxu0 %v2427_v24  ;;  %2229 = vmatpush3.bf16.msra.mxu1 %v2427_v24 }
 0x535   : > { %2194 = vmatprep.subr.bf16.mxu0 %v2428_v22  ;;  %2222 = vmatprep.subr.bf16.mxu1 %v2428_v22 }
 0x538   : > { %2195 = vmatpush3.bf16.msra.mxu0 %v2428_v22  ;;  %2230 = vmatpush3.bf16.msra.mxu1 %v2428_v22 }
 0x539   : > { %2196 = vmatprep.subr.bf16.mxu0 %v2429_v42  ;;  %2223 = vmatprep.subr.bf16.mxu1 %v2429_v42 }
 0x53c   : > { %2197 = vmatpush3.bf16.msra.mxu0 %v2429_v42  ;;  %2231 = vmatpush3.bf16.msra.mxu1 %v2429_v42 }
 0x53d   : > { %2198 = vmatprep.subr.bf16.mxu0 %v2430_v47  ;;  %2224 = vmatprep.subr.bf16.mxu1 %v2430_v47 }
 0x540   : > { %2199 = vmatpush3.bf16.msra.mxu0 %v2430_v47  ;;  %2232 = vmatpush3.bf16.msra.mxu1 %v2430_v47 }
 0x541   : > { %2200 = vmatprep.subr.bf16.mxu0 %v2431_v13  ;;  %2225 = vmatprep.subr.bf16.mxu1 %v2431_v13 }
 0x544   : > { %2201 = vmatpush3.bf16.msra.mxu0 %v2431_v13  ;;  %2233 = vmatpush3.bf16.msra.mxu1 %v2431_v13 }
 0x547   : > { %2203 = vmatmul.mubr.bf16.vlgmr.msra.gmra.mrb[0].mxu0 %v1508_v53  ;;  %2211 = vmatmul.mubr.bf16.vlgmr.msra.gmra.mrb[0].mxu1 %v1512_v26 }
 0x548   : > { %2206 = vmatprep.mubr.bf16.mxu0 %v1509_v54  ;;  %2214 = vmatprep.mubr.bf16.mxu1 %v1513_v56 }
 0x54f   : > { %2207 = vmatmul.mubr.bf16.gmra.mrb[4].mxu0 %v1510_v57  ;;  %2215 = vmatmul.mubr.bf16.gmra.mrb[4].mxu1 %v1514_v28 }
 0x61a   : > { %v2204_v59 = vpop.f32.mrb[0].mxu0  ;;  %v2212_v29 = vpop.f32.mrb[0].mxu1 }
 0x61b   : > { %v1629_v61 = vadd.f32 %v2204_v59, %v1924_v41  ;;  %v1661_v58 = vadd.f32 %v2212_v29, %v1924_v41  ;;  %v1620_v50 = vpop.f32.mrb[1].mxu0  ;;  %v1652_v30 = vpop.f32.mrb[1].mxu1 }
 0x61c   : > { %v1621_v62 = vadd.f32 %v1924_v41, %v1620_v50  ;;  %v1653_v63 = vadd.f32 %v1924_v41, %v1652_v30  ;;  %v2205_v0 = vpop.f32.mrb[2].mxu0  ;;  %v2213_v1 = vpop.f32.mrb[2].mxu1 }
 0x61d   : > { %1685 = vst [vmem:[#allocation15 + $0x10] sm:$0xff] %v1629_v61  ;;  %1693 = vst [vmem:[#allocation15 + $0x50] sm:$0xff] %v1661_v58  ;;  %v1632_v3 = vadd.f32 %v2205_v0, %v1924_v41  ;;  %v1664_v55 = vadd.f32 %v2213_v1, %v1924_v41  ;;  %v1623_v60 = vpop.f32.mrb[3].mxu0  ;;  %v1655_v48 = vpop.f32.mrb[3].mxu1 }
 0x61e   : > { %1683 = vst [vmem:[#allocation15] sm:$0xff] %v1621_v62  ;;  %1691 = vst [vmem:[#allocation15 + $0x40] sm:$0xff] %v1653_v63  ;;  %v1624_v32 = vadd.f32 %v1924_v41, %v1623_v60  ;;  %v1656_v16 = vadd.f32 %v1924_v41, %v1655_v48 }
 0x61f   : > { %1686 = vst [vmem:[#allocation15 + $0x18] sm:$0xff] %v1632_v3  ;;  %1694 = vst [vmem:[#allocation15 + $0x58] sm:$0xff] %v1664_v55 }
 0x620   : > { %1684 = vst [vmem:[#allocation15 + $0x8] sm:$0xff] %v1624_v32  ;;  %1692 = vst [vmem:[#allocation15 + $0x48] sm:$0xff] %v1656_v16 }
 0x622   : > { %v2208_v5 = vpop.f32.mrb[4].mxu0  ;;  %v2216_v6 = vpop.f32.mrb[4].mxu1 }
 0x623   : > { %v1645_v33 = vadd.f32 %v2208_v5, %v1924_v41  ;;  %v1677_v7 = vadd.f32 %v2216_v6, %v1924_v41  ;;  %v1636_v17 = vpop.f32.mrb[5].mxu0  ;;  %v1668_v8 = vpop.f32.mrb[5].mxu1 }
 0x624   : > { %v1637_v4 = vadd.f32 %v1924_v41, %v1636_v17  ;;  %v1669_v9 = vadd.f32 %v1924_v41, %v1668_v8  ;;  %v2209_v10 = vpop.f32.mrb[6].mxu0  ;;  %v2217_v35 = vpop.f32.mrb[6].mxu1 }
 0x625   : > { %1689 = vst [vmem:[#allocation15 + $0x30] sm:$0xff] %v1645_v33  ;;  %1697 = vst [vmem:[#allocation15 + $0x70] sm:$0xff] %v1677_v7  ;;  %v1648_v11 = vadd.f32 %v2209_v10, %v1924_v41  ;;  %v1680_v36 = vadd.f32 %v2217_v35, %v1924_v41  ;;  %v1639_v2 = vpop.f32.mrb[7].mxu0  ;;  %v1671_v18 = vpop.f32.mrb[7].mxu1 }
 0x626   : > { %1687 = vst [vmem:[#allocation15 + $0x20] sm:$0xff] %v1637_v4  ;;  %1695 = vst [vmem:[#allocation15 + $0x60] sm:$0xff] %v1669_v9  ;;  %v1640_v40 = vadd.f32 %v1924_v41, %v1639_v2  ;;  %v1672_v14 = vadd.f32 %v1924_v41, %v1671_v18 }
 0x627   : > { %1690 = vst [vmem:[#allocation15 + $0x38] sm:$0xff] %v1648_v11  ;;  %1698 = vst [vmem:[#allocation15 + $0x78] sm:$0xff] %v1680_v36 }
 0x628   : > { %1688 = vst [vmem:[#allocation15 + $0x28] sm:$0xff] %v1640_v40  ;;  %1696 = vst [vmem:[#allocation15 + $0x68] sm:$0xff] %v1672_v14 }
 0x629 PF: > { %p2305_p7 = scmp.eq.s32.totalorder %s2827_s11, 2  ;;  %s2758_s26 = smov [#allocation15]  }
 0x62a   : > { %s1705_s30 = sshll.u32 %s2758_s26, 4  ;;  %s1706_s30 = int_to_ptr.vmem [resolvable:$true] %s1705_s30 }
 0x62b   : > { %s2660_s27 = scalar_lea.vmem %s1706_s30, 2048  ;;  %p2667_p6 = scmp.lt.s32.totalorder %s1706_s30, %s1706_s30 }
 0x62c   : > { %p2661_p10 = scmp.ne.s32.totalorder %s1706_s30, %s2660_s27  ;;  %p2668_p11 = scmp.lt.s32.totalorder %s2660_s27, %s2660_s27 }
 0x62e   : > { %p2662_p12 = pnand %p2661_p10, %p2305_p7  ;;  %p2669_p13 = por %p2668_p11, %p2667_p6 }
 0x630   : > { %p2663_p4 = pneg %p2662_p12 }
 0x632   : > { %p2670_p0 = pnand %p2669_p13, %p2663_p4 }
 0x634   : > { %2673 = shalt.err (!%p2670_p0)
}
 0x635   : > { %s2674_s29 = scalar_lea.hbm %s3385_s8, 2048 }
 0x636   : > { %p2675_p8 = scmp.ne.s32.totalorder %s3385_s8, %s2674_s29  ;;  %p2680_p3 = scmp.lt.u32.totalorder %s2674_s29, %s3385_s8 }
 0x638   : > { %p2676_p9 = pnand %p2675_p8, %p2305_p7 }
 0x63a   : > { %p2677_p1 = pneg %p2676_p9 }
 0x63c   : > { %p2682_p5 = pnand %p2680_p3, %p2677_p1 }
 0x63e   : > { %2685 = shalt.err (!%p2682_p5)
}
 0x63f   : > { %s2759_s9 = smov 128   ;;  %s2760_s15 = smov 8  }
 0x640   : > { %2263 = dma.vmem_to_hbm [thread:$0]  (%p2305_p7), %s1706_s30, 2048, %s3385_s8, [#allocation5], %s2759_s9, %s2759_s9, %s2760_s15  }
 0x641   : > { %2727 = dma.done.wait (%p2305_p7), [#allocation5], 2048  }
 0x642   : > { %2729 = vsyncadd (%p2305_p7), [#allocation5], 4294965248 }
 0x643 PF: > { %s3440_s17 = sld [smem:[#allocation23_spill]]  ;;  %s3441_s29 = sld [smem:[#allocation24_spill]] }
 0x644   : > { %p19_p2 = scmp.ge.s32.totalorder %s2957_s20, 5   ;;  %s3442_s27 = smov %s2736_s28 }
 0x645   : > { %s3444_s30 = smov %s2957_s20 }
 0x646   :  { %21 = sbr.rel (!%p19_p2) target bundleno = 11 (0xb), region = 136 }
 0x649   : > { %s3443_s28 = smov %s3440_s17 }
 0x64d   :  { %1721 = vsyncpa [#allocation4], 1 }
 0x64e   :  { %1723 = vsyncpa [#allocation4 + $0x1], 1 }
 0x64f   :  { %1724 = vsyncpa [#allocation7], 1 }
 0x650   :  { %1725 = vsyncpa [#allocation10], 1 }
 0x651   :  { %1726 = vsyncpa [#allocation5], 1 }
 0x652   :  { %1728 = vsyncpa [#allocation5 + $0x1], 1 }

</bundles_post_ra>
